<compile_context>
chip_gen: v5e
topology: v5e:2x2
jax: 0.10.0
libtpu: 0.0.40
codegen_flags: <defaults>
</compile_context>

<pallas_src>
import functools

import jax
import jax.numpy as jnp
from jax.experimental import pallas as pl
from jax.experimental.pallas import tpu as pltpu

_COMPUTE_DTYPE = jnp.bfloat16


# ----------------------------------------------------------------------------
# helpers
# ----------------------------------------------------------------------------

def _round_up(x, m):
    return (x + m - 1) // m * m


def _vmem_budget_bytes():
    """Scoped-VMEM budget: 75% of physical, capped at 64 MiB.
    -> 64 MiB on v5e/v6e (128 MiB VMEM), ~48 MiB on v7x (64 MiB VMEM)."""
    try:
        cap = int(pltpu.get_tpu_info().vmem_capacity_bytes)
    except Exception:
        cap = 128 << 20
    return int(min(64 << 20, cap * 3 // 4))


# ----------------------------------------------------------------------------
# kernels
# ----------------------------------------------------------------------------

def _fused_mlp_kernel(x_ref, w1_ref, b1_ref, w2_ref, b2_ref, o_ref):
    """Whole MLP for one (tm, N) output stripe; W1/W2 stay resident in VMEM."""
    h = jnp.dot(x_ref[...], w1_ref[...], preferred_element_type=jnp.float32)
    h = h + b1_ref[...]
    # TODO(synk): PyTorch nn.GELU default is exact (erf) GELU; tanh approx is
    # used for guaranteed Mosaic lowering (|diff| ~ 1e-3).
    h = jax.nn.gelu(h, approximate=True)
    y = jnp.dot(h.astype(w2_ref.dtype), w2_ref[...],
                preferred_element_type=jnp.float32)
    o_ref[...] = (y + b2_ref[...]).astype(o_ref.dtype)


def _fused_linear_kernel(x_ref, w_ref, b_ref, o_ref, acc_ref, *,
                         activation, n_k):
    """One (tm, tn) output tile; K (grid axis 2) is the reduction axis."""
    k = pl.program_id(2)

    @pl.when(k == 0)
    def _():
        acc_ref[...] = jnp.zeros_like(acc_ref)

    # bf16 x bf16 -> f32 accumulate on the MXU.
    acc_ref[...] += jnp.dot(x_ref[...], w_ref[...],
                            preferred_element_type=jnp.float32)

    @pl.when(k == n_k - 1)
    def _():
        y = acc_ref[...] + b_ref[...]          # (tm, tn) + (1, tn) broadcast
        if activation == "gelu":
            y = jax.nn.gelu(y, approximate=True)
        o_ref[...] = y.astype(o_ref.dtype)


# ----------------------------------------------------------------------------
# wrappers
# ----------------------------------------------------------------------------

def fused_linear(x2, w, b, activation=None, *, out_dtype=jnp.float32,
                 tm=512, tn=512, tk=512):
    """y = activation(x2 @ w + b); x2:(M,K), w:(K,N), b:(N,). Tiled path."""
    M, K = x2.shape
    Kw, N = w.shape
    assert K == Kw

    # Tile selection: 512-class tiles; tn 256-aligned (2x256 MXU on v6e/v7x),
    # tm 16-aligned (bf16 row packing), tk >= 512 to amortize the f32
    # accumulator read-modify-write (v5e single vector-store slot).
    tm = min(tm, _round_up(M, 16))
    tn = min(tn, _round_up(N, 256))
    tk = min(tk, _round_up(K, 128))
    Mp, Np, Kp = _round_up(M, tm), _round_up(N, tn), _round_up(K, tk)

    # v7x has 2 TensorCores: keep >=2 "parallel" tiles when M collapses to one.
    if Mp // tm == 1 and Np // tn == 1 and Np >= 512:
        tn_half = _round_up(Np // 2, 256)
        if Np % tn_half == 0:
            tn = tn_half

    xk = x2.astype(_COMPUTE_DTYPE)
    wk = w.astype(_COMPUTE_DTYPE)           # no-op if params were pre-cast
    if (Mp, Kp) != (M, K):
        xk = jnp.pad(xk, ((0, Mp - M), (0, Kp - K)))
    if (Kp, Np) != (K, N):
        wk = jnp.pad(wk, ((0, Kp - K), (0, Np - N)))
    bk = b.astype(jnp.float32)
    if Np != N:
        bk = jnp.pad(bk, (0, Np - N))
    bk = bk.reshape(1, Np)

    n_k = Kp // tk
    grid = (Mp // tm, Np // tn, n_k)

    out = pl.pallas_call(
        functools.partial(_fused_linear_kernel, activation=activation, n_k=n_k),
        out_shape=jax.ShapeDtypeStruct((Mp, Np), out_dtype),
        grid=grid,
        in_specs=[
            pl.BlockSpec((tm, tk), lambda i, j, k: (i, k)),
            pl.BlockSpec((tk, tn), lambda i, j, k: (k, j)),
            pl.BlockSpec((1, tn), lambda i, j, k: (0, j)),
        ],
        out_specs=pl.BlockSpec((tm, tn), lambda i, j, k: (i, j)),
        scratch_shapes=[pltpu.VMEM((tm, tn), jnp.float32)],
        compiler_params=pltpu.CompilerParams(
            dimension_semantics=("parallel", "parallel", "arbitrary"),
            vmem_limit_bytes=_vmem_budget_bytes()),
    )(xk, wk, bk)

    if (Mp, Np) != (M, N):
        out = out[:M, :N]
    return out


def _fused_mlp_fits(M, K, H, N, tm, budget_bytes):
    """Conservative VMEM estimate for the fully-fused MLP kernel."""
    Kp, Hp, Np = _round_up(K, 128), _round_up(H, 128), _round_up(N, 128)
    need = (2 * tm * Kp * 2              # x stripe, double-buffered, bf16
            + Kp * Hp * 2 + Hp * Np * 2  # resident bf16 weights
            + 4 * (Hp + Np)              # biases (f32)
            + 2 * tm * Np * 4            # out stripe, double-buffered, f32
            + tm * Hp * 4 + tm * Np * 4)  # live f32 intermediates / spill
    return need <= budget_bytes // 2     # leave generous compiler headroom


def fused_mlp(x2, w1, b1, w2, b2, *, out_dtype=jnp.float32, tm=256):
    """Single-kernel MLP: hidden activation never leaves VMEM."""
    M, K = x2.shape
    H = w1.shape[1]
    N = w2.shape[1]
    tm = min(tm, _round_up(M, 16))
    Mp = _round_up(M, tm)
    Kp, Hp, Np = _round_up(K, 128), _round_up(H, 128), _round_up(N, 128)

    xk = x2.astype(_COMPUTE_DTYPE)
    w1k = w1.astype(_COMPUTE_DTYPE)
    w2k = w2.astype(_COMPUTE_DTYPE)
    if (Mp, Kp) != (M, K):
        xk = jnp.pad(xk, ((0, Mp - M), (0, Kp - K)))
    if (Kp, Hp) != (K, H):
        w1k = jnp.pad(w1k, ((0, Kp - K), (0, Hp - H)))
    if (Hp, Np) != (H, N):
        w2k = jnp.pad(w2k, ((0, Hp - H), (0, Np - N)))
    b1k = jnp.pad(b1.astype(jnp.float32), (0, Hp - H)).reshape(1, Hp)
    b2k = jnp.pad(b2.astype(jnp.float32), (0, Np - N)).reshape(1, Np)

    grid = (Mp // tm,)
    out = pl.pallas_call(
        _fused_mlp_kernel,
        out_shape=jax.ShapeDtypeStruct((Mp, Np), out_dtype),
        grid=grid,
        in_specs=[
            pl.BlockSpec((tm, Kp), lambda i: (i, 0)),
            pl.BlockSpec((Kp, Hp), lambda i: (0, 0)),   # resident across grid
            pl.BlockSpec((1, Hp), lambda i: (0, 0)),
            pl.BlockSpec((Hp, Np), lambda i: (0, 0)),   # resident across grid
            pl.BlockSpec((1, Np), lambda i: (0, 0)),
        ],
        out_specs=pl.BlockSpec((tm, Np), lambda i: (i, 0)),
        compiler_params=pltpu.CompilerParams(
            dimension_semantics=("parallel",),
            vmem_limit_bytes=_vmem_budget_bytes()),
    )(xk, w1k, b1k, w2k, b2k)

    if (Mp, Np) != (M, N):
        out = out[:M, :N]
    return out


# ----------------------------------------------------------------------------
# MLP forward (module semantics)
# ----------------------------------------------------------------------------

def prepare_params(params):
    """Hoist the per-call weight casts: store MXU weights in bf16 once."""
    return {
        "w1": params["w1"].astype(_COMPUTE_DTYPE),
        "b1": params["b1"].astype(jnp.float32),
        "w2": params["w2"].astype(_COMPUTE_DTYPE),
        "b2": params["b2"].astype(jnp.float32),
    }


def _mlp_apply(params, x, *, force_tiled=False):
    lead = x.shape[:-1]
    in_dim = x.shape[-1]
    hidden_dim = params["w1"].shape[1]
    out_dim = params["w2"].shape[1]
    x2 = x.reshape(-1, in_dim)
    M = x2.shape[0]

    if (not force_tiled
            and _fused_mlp_fits(M, in_dim, hidden_dim, out_dim,
                                min(256, _round_up(M, 16)),
                                _vmem_budget_bytes())):
        y = fused_mlp(x2, params["w1"], params["b1"],
                      params["w2"], params["b2"], out_dtype=jnp.float32)
    else:
        # bf16 hidden: it is re-cast to bf16 for matmul 2 anyway, so writing it
        # f32 would only double the HBM traffic of the hidden activation.
        h = fused_linear(x2, params["w1"], params["b1"], activation="gelu",
                         out_dtype=jnp.bfloat16)
        y = fused_linear(h, params["w2"], params["b2"], activation=None,
                         out_dtype=jnp.float32)
    return y.reshape(lead + (out_dim,))


def mlp_forward(params, x_data, *, force_tiled=False):
    """Mirrors MLP.forward: dict -> {'x_a','x_b'}, tuple -> (out, mask_info)."""
    if isinstance(x_data, dict):
        out = _mlp_apply(params, x_data["x_b"], force_tiled=force_tiled)
        return {"x_a": x_data["x_a"], "x_b": out}
    else:
        x, mask_info = x_data
        return (_mlp_apply(params, x, force_tiled=force_tiled), mask_info)


# ----------------------------------------------------------------------------
# reference (same bf16 MXU casts / tanh GELU)
# ----------------------------------------------------------------------------

def mlp_reference(params, x):
    xk = x.astype(_COMPUTE_DTYPE)
    h = jnp.dot(xk, params["w1"].astype(_COMPUTE_DTYPE),
                preferred_element_type=jnp.float32) + params["b1"].astype(jnp.float32)
    h = jax.nn.gelu(h, approximate=True)
    y = jnp.dot(h.astype(_COMPUTE_DTYPE), params["w2"].astype(_COMPUTE_DTYPE),
                preferred_element_type=jnp.float32) + params["b2"].astype(jnp.float32)
    return y


# ----------------------------------------------------------------------------
# demo
# ----------------------------------------------------------------------------

if __name__ == "__main__":
    # Small but lane-dense shapes (feature dims multiples of 128).
    B, SEQ, IN_DIM, HIDDEN_DIM, OUT_DIM = 2, 64, 256, 512, 256

    root = jax.random.PRNGKey(0)
    k_x, k_w1, k_b1, k_w2, k_b2 = jax.random.split(root, 5)
    x = jax.random.normal(k_x, (B, SEQ, IN_DIM), jnp.float32)

    # Weights stored as (in, out) — torch Linear weight transposed.
    raw_params = {
        "w1": 0.02 * jax.random.normal(k_w1, (IN_DIM, HIDDEN_DIM), jnp.float32),
        "b1": 0.01 * jax.random.normal(k_b1, (HIDDEN_DIM,), jnp.float32),
        "w2": 0.02 * jax.random.normal(k_w2, (HIDDEN_DIM, OUT_DIM), jnp.float32),
        "b2": 0.01 * jax.random.normal(k_b2, (OUT_DIM,), jnp.float32),
    }
    params = prepare_params(raw_params)   # bf16 weights, cast hoisted

    ref = mlp_reference(params, x.reshape(-1, IN_DIM)).reshape(B, SEQ, OUT_DIM)

    # Tuple path (fused single-kernel MLP; problem fits VMEM budget).
    mask_info = jnp.ones((B, 1, SEQ, SEQ), jnp.float32)
    out, mask_out = mlp_forward(params, (x, mask_info))
    out = jax.block_until_ready(out)

    # Dict path.
    d = mlp_forward(params, {"x_a": x, "x_b": x})
    d_out = jax.block_until_ready(d["x_b"])

    # Also exercise the tiled (two pallas_call) fallback path.
    out_tiled, _ = mlp_forward(params, (x, mask_info), force_tiled=True)
    out_tiled = jax.block_until_ready(out_tiled)

    assert out.shape == (B, SEQ, OUT_DIM)
    assert mask_out.shape == mask_info.shape
    assert d_out.shape == (B, SEQ, OUT_DIM)
    assert jnp.all(jnp.isfinite(out))
    assert jnp.allclose(out, ref, rtol=1e-2, atol=1e-2)
    assert jnp.allclose(d_out, ref, rtol=1e-2, atol=1e-2)
    assert jnp.allclose(out_tiled, ref, rtol=1e-2, atol=1e-2)
    print("KERNEL_OK")
</pallas_src>

<mosaic_0001>
module attributes {stable_mosaic.version = 11 : i64} {
  func.func @_fused_mlp_kernel(%arg0: i32, %arg1: memref<128x256xbf16, #tpu.memory_space<vmem>>, %arg2: memref<256x512xbf16, #tpu.memory_space<vmem>>, %arg3: memref<1x512xf32, #tpu.memory_space<vmem>>, %arg4: memref<512x256xbf16, #tpu.memory_space<vmem>>, %arg5: memref<1x256xf32, #tpu.memory_space<vmem>>, %arg6: memref<128x256xf32, #tpu.memory_space<vmem>>) attributes {dimension_semantics = [#tpu.dimension_semantics<parallel>], iteration_bounds = array<i64: 1>, scalar_prefetch = 0 : i64, scratch_operands = 0 : i64, tpu.core_type = #tpu.core_type<tc>, window_params = [{transform_indices = @transform_0, window_bounds = array<i64: 128, 256>}, {pipeline_mode = #tpu.pipeline_mode<synchronous>, transform_indices = @transform_1, window_bounds = array<i64: 256, 512>}, {pipeline_mode = #tpu.pipeline_mode<synchronous>, transform_indices = @transform_2, window_bounds = array<i64: 1, 512>}, {pipeline_mode = #tpu.pipeline_mode<synchronous>, transform_indices = @transform_3, window_bounds = array<i64: 512, 256>}, {pipeline_mode = #tpu.pipeline_mode<synchronous>, transform_indices = @transform_4, window_bounds = array<i64: 1, 256>}, {transform_indices = @transform_5, window_bounds = array<i64: 128, 256>}]} {
    %c0 = arith.constant 0 : index
    %c0_0 = arith.constant 0 : index
    %0 = vector.load %arg1[%c0, %c0_0] : memref<128x256xbf16, #tpu.memory_space<vmem>>, vector<128x256xbf16>
    %c0_1 = arith.constant 0 : index
    %c0_2 = arith.constant 0 : index
    %1 = vector.load %arg2[%c0_1, %c0_2] : memref<256x512xbf16, #tpu.memory_space<vmem>>, vector<256x512xbf16>
    %cst = arith.constant dense<0.000000e+00> : vector<128x512xf32>
    %2 = tpu.matmul %0, %1, %cst {dimension_numbers = #tpu.dot_dimension_numbers<[1], [0], [0], [1], [0, 0, 1, 1], [], []>} : vector<128x256xbf16>, vector<256x512xbf16>, vector<128x512xf32> -> vector<128x512xf32>
    %c0_3 = arith.constant 0 : index
    %c0_4 = arith.constant 0 : index
    %3 = vector.load %arg3[%c0_3, %c0_4] : memref<1x512xf32, #tpu.memory_space<vmem>>, vector<1x512xf32>
    %4 = vector.broadcast %3 : vector<1x512xf32> to vector<128x512xf32>
    %5 = arith.addf %2, %4 : vector<128x512xf32>
    %6 = arith.mulf %5, %5 : vector<128x512xf32>
    %7 = arith.mulf %5, %6 : vector<128x512xf32>
    %cst_5 = arith.constant 4.471500e-02 : f32
    %8 = vector.broadcast %cst_5 : f32 to vector<128x512xf32>
    %9 = arith.mulf %8, %7 : vector<128x512xf32>
    %10 = arith.addf %5, %9 : vector<128x512xf32>
    %cst_6 = arith.constant 0.797884583 : f32
    %11 = vector.broadcast %cst_6 : f32 to vector<128x512xf32>
    %12 = arith.mulf %11, %10 : vector<128x512xf32>
    %13 = math.tanh %12 : vector<128x512xf32>
    %cst_7 = arith.constant 1.000000e+00 : f32
    %14 = vector.broadcast %cst_7 : f32 to vector<128x512xf32>
    %15 = arith.addf %14, %13 : vector<128x512xf32>
    %cst_8 = arith.constant 5.000000e-01 : f32
    %16 = vector.broadcast %cst_8 : f32 to vector<128x512xf32>
    %17 = arith.mulf %16, %15 : vector<128x512xf32>
    %18 = arith.mulf %5, %17 : vector<128x512xf32>
    %19 = arith.truncf %18 : vector<128x512xf32> to vector<128x512xbf16>
    %c0_9 = arith.constant 0 : index
    %c0_10 = arith.constant 0 : index
    %20 = vector.load %arg4[%c0_9, %c0_10] : memref<512x256xbf16, #tpu.memory_space<vmem>>, vector<512x256xbf16>
    %cst_11 = arith.constant dense<0.000000e+00> : vector<128x256xf32>
    %21 = tpu.matmul %19, %20, %cst_11 {dimension_numbers = #tpu.dot_dimension_numbers<[1], [0], [0], [1], [0, 0, 1, 1], [], []>} : vector<128x512xbf16>, vector<512x256xbf16>, vector<128x256xf32> -> vector<128x256xf32>
    %c0_12 = arith.constant 0 : index
    %c0_13 = arith.constant 0 : index
    %22 = vector.load %arg5[%c0_12, %c0_13] : memref<1x256xf32, #tpu.memory_space<vmem>>, vector<1x256xf32>
    %23 = vector.broadcast %22 : vector<1x256xf32> to vector<128x256xf32>
    %24 = arith.addf %21, %23 : vector<128x256xf32>
    %c0_14 = arith.constant 0 : index
    %c0_15 = arith.constant 0 : index
    %25 = vector.load %arg6[%c0_14, %c0_15] : memref<128x256xf32, #tpu.memory_space<vmem>>, vector<128x256xf32>
    tpu.vector_store %arg6[%c0_14, %c0_15], %24 {strides = array<i32>} : memref<128x256xf32, #tpu.memory_space<vmem>>, vector<128x256xf32>,
    return
  }
  func.func @transform_0(%arg0: i32) -> (i32, i32) {
    %c0_i32 = arith.constant 0 : i32
    %c0_i32_0 = arith.constant 0 : i32
    return %arg0, %c0_i32 : i32, i32
  }
  func.func @transform_1(%arg0: i32) -> (i32, i32) {
    %c0_i32 = arith.constant 0 : i32
    %c0_i32_0 = arith.constant 0 : i32
    %c0_i32_1 = arith.constant 0 : i32
    return %c0_i32, %c0_i32_0 : i32, i32
  }
  func.func @transform_2(%arg0: i32) -> (i32, i32) {
    %c0_i32 = arith.constant 0 : i32
    %c0_i32_0 = arith.constant 0 : i32
    %c0_i32_1 = arith.constant 0 : i32
    return %c0_i32, %c0_i32_0 : i32, i32
  }
  func.func @transform_3(%arg0: i32) -> (i32, i32) {
    %c0_i32 = arith.constant 0 : i32
    %c0_i32_0 = arith.constant 0 : i32
    %c0_i32_1 = arith.constant 0 : i32
    return %c0_i32, %c0_i32_0 : i32, i32
  }
  func.func @transform_4(%arg0: i32) -> (i32, i32) {
    %c0_i32 = arith.constant 0 : i32
    %c0_i32_0 = arith.constant 0 : i32
    %c0_i32_1 = arith.constant 0 : i32
    return %c0_i32, %c0_i32_0 : i32, i32
  }
  func.func @transform_5(%arg0: i32) -> (i32, i32) {
    %c0_i32 = arith.constant 0 : i32
    %c0_i32_0 = arith.constant 0 : i32
    return %arg0, %c0_i32 : i32, i32
  }
}

</mosaic_0001>

<bundles_post_ra>
// kernel: tpu_custom_call.1
= control target key start
LH: loop header
LB: loop body
LE: loop exit
PB: predicated region body
PF: predicated region fallthrough
CT: control target
= control target key end

     0   :  { %10 = vsyncpa [#allocation3], 0  ;;  %s4280_s0 = inlined_call_operand.hbm [shape: bf16[128,256], index: 0, kind: input, shape index: {}]   ;;  %s4281_s1 = inlined_call_operand.hbm [shape: bf16[256,512], index: 1, kind: input, shape index: {}]   ;;  %s4282_s2 = inlined_call_operand.hbm [shape: f32[1,512], index: 2, kind: input, shape index: {}]   ;;  %s4283_s3 = inlined_call_operand.hbm [shape: bf16[512,256], index: 3, kind: input, shape index: {}]   ;;  %s4284_s4 = inlined_call_operand.vmem [shape: f32[1,256], index: 4, kind: input, shape index: {}]   ;;  %s4285_s5 = inlined_call_operand.hbm [shape: f32[128,256], index: 5, kind: output, shape index: {}]  }
   0x1   :  { %11 = vsyncpa [#allocation6], 0 }
   0x2   :  { %12 = vsyncpa [#allocation9], 0  ;;  %s31_s20 = sshll.u32 %s4281_s1, 4  ;;  %s32_s20 = int_to_ptr.hbm [resolvable:$true] %s31_s20 }
   0x3   :  { %13 = vsyncpa [#allocation4], 0  ;;  %s3393_s21 = smov [#allocation5]   ;;  %s18_s25 = sshll.u32 %s4280_s0, 4  ;;  %s19_s25 = int_to_ptr.hbm [resolvable:$true] %s18_s25 }
   0x4   :  { %s33_s22 = sshll.u32 %s3393_s21, 4  ;;  %s3394_s26 = smov 256   ;;  %s34_s22 = int_to_ptr.vmem [resolvable:$true] %s33_s22 }
   0x5   :  { %s3395_s27 = smov 16   ;;  %s3396_s28 = smov [#allocation2]  }
   0x6   :  { %39 = dma.hbm_to_vmem [thread:$0]  %s32_s20, 8192, %s34_s22, [#allocation6], %s3394_s26, %s3394_s26, %s3395_s27  }
   0x7   :  { %s20_s29 = sshll.u32 %s3396_s28, 4  ;;  %s3397_s1 = smov 128   ;;  %s21_s29 = int_to_ptr.vmem [resolvable:$true] %s20_s29 }
   0x8   :  { %s3398_s30 = smov 8   ;;  %s45_s8 = sshll.u32 %s4282_s2, 4  ;;  %s46_s8 = int_to_ptr.hbm [resolvable:$true] %s45_s8 }
   0x9   :  { %26 = dma.hbm_to_vmem [thread:$0]  %s19_s25, 2048, %s21_s29, [#allocation3], %s3397_s1, %s3397_s1, %s3398_s30  }
   0xa   :  { %s3399_s9 = smov [#allocation7]   ;;  %s55_s12 = sshll.u32 %s4283_s3, 4  ;;  %s56_s12 = int_to_ptr.hbm [resolvable:$true] %s55_s12 }
   0xb   :  { %s47_s0 = sshll.u32 %s3399_s9, 4  ;;  %s3400_s13 = smov [#allocation8]   ;;  %s48_s0 = int_to_ptr.vmem [resolvable:$true] %s47_s0 }
   0xc   :  { %50 = dma.hbm_to_vmem [thread:$0]  %s46_s8, 64, %s48_s0, [#allocation6]  }
   0xd   :  { %s57_s14 = sshll.u32 %s3400_s13, 4  ;;  %s58_s14 = int_to_ptr.vmem [resolvable:$true] %s57_s14 }
   0xe   :  { %63 = dma.hbm_to_vmem [thread:$0]  %s56_s12, 8192, %s58_s14, [#allocation9], %s3397_s1, %s3397_s1, %s3398_s30  }
   0xf   :  { %3385 = dma.done.wait [#allocation3], 2048  }
  0x10   :  { %3386 = vsyncadd [#allocation3], 4294965248 }
  0x11   :  { %3387 = dma.done.wait [#allocation6], 8256  }
  0x12   :  { %3388 = vsyncadd [#allocation6], 4294959040 }
  0x13   :  { %3389 = dma.done.wait [#allocation9], 8192  }
  0x14   :  { %3390 = vsyncadd [#allocation9], 4294959104  ;;  %v2585_v0 = vld [vmem:[#allocation5 + $0xe0] sm:$0xf]  ;;  %v3029_v1 = vld [vmem:[#allocation5 + $0xec] sm:$0xf0] }
  0x15   :  { %v2713_v2 = vld [vmem:[#allocation5 + $0x1e0] sm:$0xf]  ;;  %v2586_v3 = vor.u32 %v3029_v1, %v2585_v0  ;;  %v3061_v4 = vld [vmem:[#allocation5 + $0x1ec] sm:$0xf0]  ;;  %v3027_v5 = vld [vmem:[#allocation5 + $0xe4] sm:$0xf] }
  0x16   :  { %v2587_v6 = vld [vmem:[#allocation5 + $0xf0] sm:$0xf0]  ;;  %v2714_v7 = vor.u32 %v3061_v4, %v2713_v2  ;;  %v3059_v9 = vld [vmem:[#allocation5 + $0x1e4] sm:$0xf]  ;;  %v2569_v11 = vld [vmem:[#allocation5 + $0xc0] sm:$0xf] }
  0x17   :  { %v2590_v8 = vor.u32 %v3027_v5, %v2587_v6  ;;  %v2715_v10 = vld [vmem:[#allocation5 + $0x1f0] sm:$0xf0]  ;;  %572 = vmatpush.bf16.msra.mxu0 %v2586_v3  ;;  %v3025_v13 = vld [vmem:[#allocation5 + $0xcc] sm:$0xf0]  ;;  %v2697_v14 = vld [vmem:[#allocation5 + $0x1c0] sm:$0xf] }
  0x18   :  { %v2718_v12 = vor.u32 %v3059_v9, %v2715_v10  ;;  %v3057_v15 = vld [vmem:[#allocation5 + $0x1cc] sm:$0xf0]  ;;  %621 = vmatpush.bf16.msra.mxu1 %v2714_v7  ;;  %v2570_v16 = vor.u32 %v3025_v13, %v2569_v11  ;;  %v3023_v18 = vld [vmem:[#allocation5 + $0xc4] sm:$0xf]  ;;  %v2571_v19 = vld [vmem:[#allocation5 + $0xd0] sm:$0xf0] }
  0x19   :  { %670 = vmatpush.bf16.msra.mxu2 %v2590_v8  ;;  %v2698_v17 = vor.u32 %v3057_v15, %v2697_v14  ;;  %v3055_v20 = vld [vmem:[#allocation5 + $0x1c4] sm:$0xf]  ;;  %v2574_v21 = vor.u32 %v3023_v18, %v2571_v19  ;;  %v2699_v22 = vld [vmem:[#allocation5 + $0x1d0] sm:$0xf0]  ;;  %v2553_v23 = vld [vmem:[#allocation5 + $0xa0] sm:$0xf] }
  0x1a   :  { %719 = vmatpush.bf16.msra.mxu3 %v2718_v12  ;;  %v3021_v24 = vld [vmem:[#allocation5 + $0xac] sm:$0xf0]  ;;  %v2702_v25 = vor.u32 %v3055_v20, %v2699_v22  ;;  %v2681_v26 = vld [vmem:[#allocation5 + $0x1a0] sm:$0xf]  ;;  %v3019_v28 = vld [vmem:[#allocation5 + $0xa4] sm:$0xf] }
  0x1b   :  { %v3053_v27 = vld [vmem:[#allocation5 + $0x1ac] sm:$0xf0]  ;;  %573 = vmatpush.bf16.msra.mxu0 %v2570_v16  ;;  %v2554_v29 = vor.u32 %v3021_v24, %v2553_v23  ;;  %v2555_v30 = vld [vmem:[#allocation5 + $0xb0] sm:$0xf0]  ;;  %v3051_v31 = vld [vmem:[#allocation5 + $0x1a4] sm:$0xf] }
  0x1c   :  { %v2683_v32 = vld [vmem:[#allocation5 + $0x1b0] sm:$0xf0]  ;;  %622 = vmatpush.bf16.msra.mxu1 %v2698_v17  ;;  %v2682_v33 = vor.u32 %v3053_v27, %v2681_v26  ;;  %v2558_v34 = vor.u32 %v3019_v28, %v2555_v30  ;;  %v2537_v35 = vld [vmem:[#allocation5 + $0x80] sm:$0xf]  ;;  %v3017_v36 = vld [vmem:[#allocation5 + $0x8c] sm:$0xf0] }
  0x1d   :  { %671 = vmatpush.bf16.msra.mxu2 %v2574_v21  ;;  %v2665_v37 = vld [vmem:[#allocation5 + $0x180] sm:$0xf]  ;;  %v2686_v38 = vor.u32 %v3051_v31, %v2683_v32  ;;  %v3049_v39 = vld [vmem:[#allocation5 + $0x18c] sm:$0xf0]  ;;  %v3015_v40 = vld [vmem:[#allocation5 + $0x84] sm:$0xf]  ;;  %v2538_v44 = vor.u32 %v3017_v36, %v2537_v35 }
  0x1e   :  { %720 = vmatpush.bf16.msra.mxu3 %v2702_v25  ;;  %v2539_v41 = vld [vmem:[#allocation5 + $0x90] sm:$0xf0]  ;;  %v3047_v42 = vld [vmem:[#allocation5 + $0x184] sm:$0xf]  ;;  %v2666_v45 = vor.u32 %v3049_v39, %v2665_v37  ;;  %v2521_v47 = vld [vmem:[#allocation5 + $0x60] sm:$0xf] }
  0x1f   :  { %v2667_v43 = vld [vmem:[#allocation5 + $0x190] sm:$0xf0]  ;;  %574 = vmatpush.bf16.msra.mxu0 %v2554_v29  ;;  %v2542_v46 = vor.u32 %v3015_v40, %v2539_v41  ;;  %v3013_v48 = vld [vmem:[#allocation5 + $0x6c] sm:$0xf0]  ;;  %v2649_v49 = vld [vmem:[#allocation5 + $0x160] sm:$0xf] }
  0x20   :  { %623 = vmatpush.bf16.msra.mxu1 %v2682_v33  ;;  %v2670_v50 = vor.u32 %v3047_v42, %v2667_v43  ;;  %v3045_v51 = vld [vmem:[#allocation5 + $0x16c] sm:$0xf0]  ;;  %v3011_v52 = vld [vmem:[#allocation5 + $0x64] sm:$0xf]  ;;  %v2523_v53 = vld [vmem:[#allocation5 + $0x70] sm:$0xf0]  ;;  %v2522_v56 = vor.u32 %v3013_v48, %v2521_v47 }
  0x21   :  { %672 = vmatpush.bf16.msra.mxu2 %v2558_v34  ;;  %v3043_v54 = vld [vmem:[#allocation5 + $0x164] sm:$0xf]  ;;  %v2651_v55 = vld [vmem:[#allocation5 + $0x170] sm:$0xf0]  ;;  %v2650_v57 = vor.u32 %v3045_v51, %v2649_v49  ;;  %v2526_v58 = vor.u32 %v3011_v52, %v2523_v53  ;;  %v2505_v59 = vld [vmem:[#allocation5 + $0x40] sm:$0xf] }
  0x22   :  { %721 = vmatpush.bf16.msra.mxu3 %v2686_v38  ;;  %v3009_v60 = vld [vmem:[#allocation5 + $0x4c] sm:$0xf0]  ;;  %v2633_v61 = vld [vmem:[#allocation5 + $0x140] sm:$0xf]  ;;  %v2654_v62 = vor.u32 %v3043_v54, %v2651_v55  ;;  %v3007_v0 = vld [vmem:[#allocation5 + $0x44] sm:$0xf] }
  0x23   :  { %575 = vmatpush.bf16.msra.mxu0 %v2538_v44  ;;  %v3041_v63 = vld [vmem:[#allocation5 + $0x14c] sm:$0xf0]  ;;  %v2507_v1 = vld [vmem:[#allocation5 + $0x50] sm:$0xf0]  ;;  %v3039_v2 = vld [vmem:[#allocation5 + $0x144] sm:$0xf]  ;;  %v2506_v4 = vor.u32 %v3009_v60, %v2505_v59 }
  0x24   :  { %624 = vmatpush.bf16.msra.mxu1 %v2666_v45  ;;  %v2635_v3 = vld [vmem:[#allocation5 + $0x150] sm:$0xf0]  ;;  %v2634_v5 = vor.u32 %v3041_v63, %v2633_v61  ;;  %v2510_v6 = vor.u32 %v3007_v0, %v2507_v1  ;;  %v2489_v7 = vld [vmem:[#allocation5 + $0x20] sm:$0xf]  ;;  %v3005_v8 = vld [vmem:[#allocation5 + $0x2c] sm:$0xf0] }
  0x25   :  { %673 = vmatpush.bf16.msra.mxu2 %v2542_v46  ;;  %v2617_v9 = vld [vmem:[#allocation5 + $0x120] sm:$0xf]  ;;  %v2638_v10 = vor.u32 %v3039_v2, %v2635_v3  ;;  %v3037_v11 = vld [vmem:[#allocation5 + $0x12c] sm:$0xf0]  ;;  %v3003_v12 = vld [vmem:[#allocation5 + $0x24] sm:$0xf]  ;;  %v2490_v16 = vor.u32 %v3005_v8, %v2489_v7 }
  0x26   :  { %722 = vmatpush.bf16.msra.mxu3 %v2670_v50  ;;  %v2491_v13 = vld [vmem:[#allocation5 + $0x30] sm:$0xf0]  ;;  %v3035_v14 = vld [vmem:[#allocation5 + $0x124] sm:$0xf]  ;;  %v2473_v17 = vld [vmem:[#allocation5] sm:$0xf]  ;;  %v2618_v19 = vor.u32 %v3037_v11, %v2617_v9 }
  0x27   :  { %576 = vmatpush.bf16.msra.mxu0 %v2522_v56  ;;  %v2619_v15 = vld [vmem:[#allocation5 + $0x130] sm:$0xf0]  ;;  %v3001_v18 = vld [vmem:[#allocation5 + $0xc] sm:$0xf0]  ;;  %v2494_v20 = vor.u32 %v3003_v12, %v2491_v13  ;;  %v2601_v21 = vld [vmem:[#allocation5 + $0x100] sm:$0xf] }
  0x28   :  { %625 = vmatpush.bf16.msra.mxu1 %v2650_v57  ;;  %v3033_v22 = vld [vmem:[#allocation5 + $0x10c] sm:$0xf0]  ;;  %v2999_v23 = vld [vmem:[#allocation5 + $0x4] sm:$0xf]  ;;  %v2622_v24 = vor.u32 %v3035_v14, %v2619_v15  ;;  %v2475_v25 = vld [vmem:[#allocation5 + $0x10] sm:$0xf0]  ;;  %v2474_v31 = vor.u32 %v3001_v18, %v2473_v17 }
  0x29   :  { %674 = vmatpush.bf16.msra.mxu2 %v2526_v58  ;;  %v3031_v26 = vld [vmem:[#allocation5 + $0x104] sm:$0xf]  ;;  %v2603_v27 = vld [vmem:[#allocation5 + $0x110] sm:$0xf0]  ;;  %v2409_v28 = vld [vmem:[#allocation2] sm:$0xf]  ;;  %v2602_v35 = vor.u32 %v3033_v22, %v2601_v21  ;;  %v2478_v36 = vor.u32 %v2999_v23, %v2475_v25 }
  0x2a   :  { %723 = vmatpush.bf16.msra.mxu3 %v2654_v62  ;;  %v3028_v29 = vld [vmem:[#allocation5 + $0xec] sm:$0xf]  ;;  %v2595_v30 = vld [vmem:[#allocation5 + $0xf8] sm:$0xf0]  ;;  %v2984_v32 = vld [vmem:[#allocation2 + $0x4] sm:$0xf0]  ;;  %v2606_v39 = vor.u32 %v3031_v26, %v2603_v27 }
  0x2b   :  { %577 = vmatpush.bf16.msra.mxu0 %v2506_v4  ;;  %v3060_v33 = vld [vmem:[#allocation5 + $0x1ec] sm:$0xf]  ;;  %v2723_v34 = vld [vmem:[#allocation5 + $0x1f8] sm:$0xf0]  ;;  %v2983_v37 = vld [vmem:[#allocation2 + $0x4] sm:$0xf]  ;;  %v2598_v40 = vor.u32 %v3028_v29, %v2595_v30  ;;  %v3447_v44 = vor.u32 %v2984_v32, %v2409_v28 }
  0x2c   :  { %626 = vmatpush.bf16.msra.mxu1 %v2634_v5  ;;  %v2411_v38 = vld [vmem:[#allocation2 + $0x8] sm:$0xf0]  ;;  %v2593_v41 = vld [vmem:[#allocation5 + $0xe8] sm:$0xf]  ;;  %v3030_v42 = vld [vmem:[#allocation5 + $0xf4] sm:$0xf0]  ;;  %v2726_v45 = vor.u32 %v3060_v33, %v2723_v34 }
  0x2d   :  { %675 = vmatpush.bf16.msra.mxu2 %v2510_v6  ;;  %v2721_v43 = vld [vmem:[#allocation5 + $0x1e8] sm:$0xf]  ;;  %v3062_v46 = vld [vmem:[#allocation5 + $0x1f4] sm:$0xf0]  ;;  %v3024_v47 = vld [vmem:[#allocation5 + $0xcc] sm:$0xf]  ;;  %v3449_v49 = vor.u32 %v2983_v37, %v2411_v38  ;;  %v2594_v52 = vor.u32 %v3030_v42, %v2593_v41 }
  0x2e   :  { %724 = vmatpush.bf16.msra.mxu3 %v2638_v10  ;;  %v2579_v48 = vld [vmem:[#allocation5 + $0xd8] sm:$0xf0]  ;;  %v3056_v50 = vld [vmem:[#allocation5 + $0x1cc] sm:$0xf]  ;;  %v2722_v53 = vor.u32 %v3062_v46, %v2721_v43  ;;  %v2577_v55 = vld [vmem:[#allocation5 + $0xc8] sm:$0xf] }
  0x2f   :  { %578 = vmatpush.bf16.msra.mxu0 %v2490_v16  ;;  %v2707_v51 = vld [vmem:[#allocation5 + $0x1d8] sm:$0xf0]  ;;  %v2582_v54 = vor.u32 %v3024_v47, %v2579_v48  ;;  %v3026_v56 = vld [vmem:[#allocation5 + $0xd4] sm:$0xf0]  ;;  %v2705_v58 = vld [vmem:[#allocation5 + $0x1c8] sm:$0xf] }
  0x30   :  { %627 = vmatpush.bf16.msra.mxu1 %v2618_v19  ;;  %v2710_v57 = vor.u32 %v3056_v50, %v2707_v51  ;;  %v3058_v59 = vld [vmem:[#allocation5 + $0x1d4] sm:$0xf0]  ;;  %v2578_v60 = vor.u32 %v3026_v56, %v2577_v55  ;;  %v3020_v61 = vld [vmem:[#allocation5 + $0xac] sm:$0xf]  ;;  %v2563_v62 = vld [vmem:[#allocation5 + $0xb8] sm:$0xf0] }
  0x31   :  { %676 = vmatpush.bf16.msra.mxu2 %v2494_v20  ;;  %v3052_v63 = vld [vmem:[#allocation5 + $0x1ac] sm:$0xf]  ;;  %v2706_v0 = vor.u32 %v3058_v59, %v2705_v58  ;;  %v2566_v1 = vor.u32 %v3020_v61, %v2563_v62  ;;  %v2691_v2 = vld [vmem:[#allocation5 + $0x1b8] sm:$0xf0]  ;;  %v2561_v3 = vld [vmem:[#allocation5 + $0xa8] sm:$0xf] }
  0x32   :  { %725 = vmatpush.bf16.msra.mxu3 %v2622_v24  ;;  %v3022_v4 = vld [vmem:[#allocation5 + $0xb4] sm:$0xf0]  ;;  %v2694_v5 = vor.u32 %v3052_v63, %v2691_v2  ;;  %v2689_v6 = vld [vmem:[#allocation5 + $0x1a8] sm:$0xf]  ;;  %v2417_v10 = vld [vmem:[#allocation2 + $0x10] sm:$0xf] }
  0x33   :  { %579 = vmatpush.bf16.msra.mxu0 %v2474_v31  ;;  %v3054_v7 = vld [vmem:[#allocation5 + $0x1b4] sm:$0xf0]  ;;  %v2562_v8 = vor.u32 %v3022_v4, %v2561_v3  ;;  %v2985_v12 = vld [vmem:[#allocation2 + $0x14] sm:$0xf]  ;;  %v2419_v13 = vld [vmem:[#allocation2 + $0x18] sm:$0xf0] }
  0x34   :  { %628 = vmatpush.bf16.msra.mxu1 %v2602_v35  ;;  %v2690_v9 = vor.u32 %v3054_v7, %v2689_v6  ;;  %v2986_v11 = vld [vmem:[#allocation2 + $0x14] sm:$0xf0]  ;;  %v3457_v15 = vor.u32 %v2985_v12, %v2419_v13  ;;  %v3016_v16 = vld [vmem:[#allocation5 + $0x8c] sm:$0xf]  ;;  %v2547_v17 = vld [vmem:[#allocation5 + $0x98] sm:$0xf0] }
  0x35   :  { %677 = vmatpush.bf16.msra.mxu2 %v2478_v36  ;;  %v3455_v14 = vor.u32 %v2986_v11, %v2417_v10  ;;  %v3048_v18 = vld [vmem:[#allocation5 + $0x18c] sm:$0xf]  ;;  %v2550_v19 = vor.u32 %v3016_v16, %v2547_v17  ;;  %v2675_v20 = vld [vmem:[#allocation5 + $0x198] sm:$0xf0]  ;;  %v2545_v21 = vld [vmem:[#allocation5 + $0x88] sm:$0xf] }
  0x36   :  { %726 = vmatpush.bf16.msra.mxu3 %v2606_v39  ;;  %580 = vmatmul.bf16.vlgmr.msra.gmra.mxu0 %v3447_v44  ;;  %v3018_v22 = vld [vmem:[#allocation5 + $0x94] sm:$0xf0]  ;;  %v2678_v23 = vor.u32 %v3048_v18, %v2675_v20  ;;  %v2673_v25 = vld [vmem:[#allocation5 + $0x188] sm:$0xf]  ;;  %v2425_v28 = vld [vmem:[#allocation2 + $0x20] sm:$0xf] }
  0x37   :  { %629 = vmatmul.bf16.vlgmr.msra.gmra.mxu1 %v3449_v49  ;;  %768 = vmatpush.bf16.msrb.mxu0 %v2594_v52  ;;  %v2546_v24 = vor.u32 %v3018_v22, %v2545_v21  ;;  %v3050_v26 = vld [vmem:[#allocation5 + $0x194] sm:$0xf0]  ;;  %v2988_v29 = vld [vmem:[#allocation2 + $0x24] sm:$0xf0]  ;;  %v2987_v30 = vld [vmem:[#allocation2 + $0x24] sm:$0xf] }
  0x38   :  { %678 = vmatmul.bf16.vlgmr.msra.gmra.mxu2 %v3447_v44  ;;  %817 = vmatpush.bf16.msrb.mxu1 %v2722_v53  ;;  %v2674_v27 = vor.u32 %v3050_v26, %v2673_v25  ;;  %v2427_v31 = vld [vmem:[#allocation2 + $0x28] sm:$0xf0]  ;;  %v3463_v32 = vor.u32 %v2988_v29, %v2425_v28  ;;  %v2531_v35 = vld [vmem:[#allocation5 + $0x78] sm:$0xf0]  ;;  %v2529_v39 = vld [vmem:[#allocation5 + $0x68] sm:$0xf] }
  0x39   :  { %866 = vmatpush.bf16.msrb.mxu2 %v2598_v40  ;;  %727 = vmatmul.bf16.vlgmr.msra.gmra.mxu3 %v3449_v49  ;;  %v3465_v33 = vor.u32 %v2987_v30, %v2427_v31  ;;  %v3012_v34 = vld [vmem:[#allocation5 + $0x6c] sm:$0xf]  ;;  %v2659_v38 = vld [vmem:[#allocation5 + $0x178] sm:$0xf0]  ;;  %v3014_v40 = vld [vmem:[#allocation5 + $0x74] sm:$0xf0] }
  0x3a   :  { %915 = vmatpush.bf16.msrb.mxu3 %v2726_v45  ;;  %v3044_v36 = vld [vmem:[#allocation5 + $0x16c] sm:$0xf]  ;;  %v2534_v37 = vor.u32 %v3012_v34, %v2531_v35  ;;  %v2530_v42 = vor.u32 %v3014_v40, %v2529_v39  ;;  %v2657_v43 = vld [vmem:[#allocation5 + $0x168] sm:$0xf]  ;;  %v3046_v45 = vld [vmem:[#allocation5 + $0x174] sm:$0xf0] }
  0x3b   :  { %769 = vmatpush.bf16.msrb.mxu0 %v2578_v60  ;;  %v2662_v41 = vor.u32 %v3044_v36, %v2659_v38  ;;  %v2658_v46 = vor.u32 %v3046_v45, %v2657_v43  ;;  %v2433_v47 = vld [vmem:[#allocation2 + $0x30] sm:$0xf]  ;;  %v2990_v48 = vld [vmem:[#allocation2 + $0x34] sm:$0xf0]  ;;  %v2989_v50 = vld [vmem:[#allocation2 + $0x34] sm:$0xf] }
  0x3c   :  { %818 = vmatpush.bf16.msrb.mxu1 %v2706_v0  ;;  %v2435_v51 = vld [vmem:[#allocation2 + $0x38] sm:$0xf0]  ;;  %v3471_v52 = vor.u32 %v2990_v48, %v2433_v47  ;;  %v3040_v56 = vld [vmem:[#allocation5 + $0x14c] sm:$0xf]  ;;  %v2513_v59 = vld [vmem:[#allocation5 + $0x48] sm:$0xf] }
  0x3d   :  { %867 = vmatpush.bf16.msrb.mxu2 %v2582_v54  ;;  %v3473_v53 = vor.u32 %v2989_v50, %v2435_v51  ;;  %v3008_v54 = vld [vmem:[#allocation5 + $0x4c] sm:$0xf]  ;;  %v2515_v55 = vld [vmem:[#allocation5 + $0x58] sm:$0xf0]  ;;  %v3010_v60 = vld [vmem:[#allocation5 + $0x54] sm:$0xf0] }
  0x3e   :  { %916 = vmatpush.bf16.msrb.mxu3 %v2710_v57  ;;  %v2518_v57 = vor.u32 %v3008_v54, %v2515_v55  ;;  %v2643_v58 = vld [vmem:[#allocation5 + $0x158] sm:$0xf0]  ;;  %v2514_v62 = vor.u32 %v3010_v60, %v2513_v59  ;;  %v2641_v63 = vld [vmem:[#allocation5 + $0x148] sm:$0xf]  ;;  %v3042_v0 = vld [vmem:[#allocation5 + $0x154] sm:$0xf0] }
  0x3f   :  { %770 = vmatpush.bf16.msrb.mxu0 %v2562_v8  ;;  %v2646_v61 = vor.u32 %v3040_v56, %v2643_v58  ;;  %v2441_v2 = vld [vmem:[#allocation2 + $0x40] sm:$0xf]  ;;  %v2992_v3 = vld [vmem:[#allocation2 + $0x44] sm:$0xf0]  ;;  %v2991_v4 = vld [vmem:[#allocation2 + $0x44] sm:$0xf] }
  0x40   :  { %819 = vmatpush.bf16.msrb.mxu1 %v2690_v9  ;;  %v3479_v6 = vor.u32 %v2992_v3, %v2441_v2  ;;  %v3004_v8 = vld [vmem:[#allocation5 + $0x2c] sm:$0xf]  ;;  %v2499_v9 = vld [vmem:[#allocation5 + $0x38] sm:$0xf0]  ;;  %v2497_v13 = vld [vmem:[#allocation5 + $0x28] sm:$0xf] }
  0x41   :  { %868 = vmatpush.bf16.msrb.mxu2 %v2566_v1  ;;  %v2642_v1 = vor.u32 %v3042_v0, %v2641_v63  ;;  %v3036_v10 = vld [vmem:[#allocation5 + $0x12c] sm:$0xf]  ;;  %v2502_v11 = vor.u32 %v3004_v8, %v2499_v9  ;;  %v2627_v12 = vld [vmem:[#allocation5 + $0x138] sm:$0xf0]  ;;  %v3006_v16 = vld [vmem:[#allocation5 + $0x34] sm:$0xf0] }
  0x42   :  { %917 = vmatpush.bf16.msrb.mxu3 %v2694_v5  ;;  %v2443_v5 = vld [vmem:[#allocation2 + $0x48] sm:$0xf0]  ;;  %v2630_v17 = vor.u32 %v3036_v10, %v2627_v12  ;;  %v2498_v18 = vor.u32 %v3006_v16, %v2497_v13  ;;  %v3038_v20 = vld [vmem:[#allocation5 + $0x134] sm:$0xf0]  ;;  %v2449_v22 = vld [vmem:[#allocation2 + $0x50] sm:$0xf] }
  0x43   :  { %771 = vmatpush.bf16.msrb.mxu0 %v2546_v24  ;;  %v3481_v7 = vor.u32 %v2991_v4, %v2443_v5  ;;  %v2993_v24 = vld [vmem:[#allocation2 + $0x54] sm:$0xf]  ;;  %v2451_v25 = vld [vmem:[#allocation2 + $0x58] sm:$0xf0]  ;;  %v3000_v28 = vld [vmem:[#allocation5 + $0xc] sm:$0xf] }
  0x44   :  { %820 = vmatpush.bf16.msrb.mxu1 %v2674_v27  ;;  %v3489_v27 = vor.u32 %v2993_v24, %v2451_v25  ;;  %v2483_v29 = vld [vmem:[#allocation5 + $0x18] sm:$0xf0]  ;;  %v3032_v30 = vld [vmem:[#allocation5 + $0x10c] sm:$0xf]  ;;  %v2481_v35 = vld [vmem:[#allocation5 + $0x8] sm:$0xf] }
  0x45   :  { %869 = vmatpush.bf16.msrb.mxu2 %v2550_v19  ;;  %v2625_v19 = vld [vmem:[#allocation5 + $0x128] sm:$0xf]  ;;  %v2486_v31 = vor.u32 %v3000_v28, %v2483_v29  ;;  %v2611_v34 = vld [vmem:[#allocation5 + $0x118] sm:$0xf0]  ;;  %v3002_v36 = vld [vmem:[#allocation5 + $0x14] sm:$0xf0] }
  0x46   :  { %585 = vmatmul.bf16.gmra.mxu0 %v3455_v14  ;;  %918 = vmatpush.bf16.msrb.mxu3 %v2678_v23  ;;  %v2626_v21 = vor.u32 %v3038_v20, %v2625_v19  ;;  %v2994_v23 = vld [vmem:[#allocation2 + $0x54] sm:$0xf0]  ;;  %v2482_v38 = vor.u32 %v3002_v36, %v2481_v35  ;;  %v2609_v39 = vld [vmem:[#allocation5 + $0x108] sm:$0xf]  ;;  %v2995_v45 = vld [vmem:[#allocation2 + $0x64] sm:$0xf] }
  0x47   :  { %634 = vmatmul.bf16.gmra.mxu1 %v3457_v15  ;;  %772 = vmatpush.bf16.msrb.mxu0 %v2530_v42  ;;  %v3487_v26 = vor.u32 %v2994_v23, %v2449_v22  ;;  %v3034_v40 = vld [vmem:[#allocation5 + $0x114] sm:$0xf0]  ;;  %v2457_v42 = vld [vmem:[#allocation2 + $0x60] sm:$0xf]  ;;  %v2996_v43 = vld [vmem:[#allocation2 + $0x64] sm:$0xf0] }
  0x48   :  { %683 = vmatmul.bf16.gmra.mxu2 %v3455_v14  ;;  %821 = vmatpush.bf16.msrb.mxu1 %v2658_v46  ;;  %v2459_v46 = vld [vmem:[#allocation2 + $0x68] sm:$0xf0]  ;;  %v3495_v47 = vor.u32 %v2996_v43, %v2457_v42  ;;  %v2465_v50 = vld [vmem:[#allocation2 + $0x70] sm:$0xf]  ;;  %v2998_v51 = vld [vmem:[#allocation2 + $0x74] sm:$0xf0] }
  0x49   :  { %732 = vmatmul.bf16.gmra.mxu3 %v3457_v15  ;;  %870 = vmatpush.bf16.msrb.mxu2 %v2534_v37  ;;  %v2614_v37 = vor.u32 %v3032_v30, %v2611_v34  ;;  %v3497_v48 = vor.u32 %v2995_v45, %v2459_v46  ;;  %v2997_v54 = vld [vmem:[#allocation2 + $0x74] sm:$0xf]  ;;  %v2467_v55 = vld [vmem:[#allocation2 + $0x78] sm:$0xf0]  ;;  %v3503_v56 = vor.u32 %v2998_v51, %v2465_v50  ;;  %v3511_v58 = vld [vmem:[#allocation7] sm:$0xf] }
  0x4a   :  { %919 = vmatpush.bf16.msrb.mxu3 %v2662_v41  ;;  %v2610_v41 = vor.u32 %v3034_v40, %v2609_v39  ;;  %v3514_v59 = vperm.slane %v3511_v58, 0  ;;  %v3523_v0 = vperm.slane %v3511_v58, 1  ;;  %v2913_v42 = vld [vmem:[#allocation8 + $0x170] sm:$0xf]  ;;  %v3110_v43 = vld [vmem:[#allocation8 + $0x174] sm:$0xf0] }
  0x4b   :  { %773 = vmatpush.bf16.msrb.mxu0 %v2514_v62  ;;  %v2914_v50 = vor.u32 %v3110_v43, %v2913_v42  ;;  %v2785_v51 = vld [vmem:[#allocation8 + $0x70] sm:$0xf]  ;;  %s2392_s18 = sshll.u32 %s4285_s5, 4  ;;  %s2393_s18 = int_to_ptr.hbm [resolvable:$true] %s2392_s18 }
  0x4c   :  { %822 = vmatpush.bf16.msrb.mxu1 %v2642_v1 }
  0x4d   :  { %871 = vmatpush.bf16.msrb.mxu2 %v2518_v57  ;;  %v3505_v57 = vor.u32 %v2997_v54, %v2467_v55  ;;  %v3078_v54 = vld [vmem:[#allocation8 + $0x74] sm:$0xf0] }
  0x4e   :  { %920 = vmatpush.bf16.msrb.mxu3 %v2646_v61 }
  0x4f   :  { %774 = vmatpush.bf16.msrb.mxu0 %v2498_v18 }
  0x50   :  { %823 = vmatpush.bf16.msrb.mxu1 %v2626_v21 }
  0x51   :  { %872 = vmatpush.bf16.msrb.mxu2 %v2502_v11 }
  0x52   :  { %921 = vmatpush.bf16.msrb.mxu3 %v2630_v17 }
  0x53   :  { %775 = vmatpush.bf16.msrb.mxu0 %v2482_v38 }
  0x54   :  { %824 = vmatpush.bf16.msrb.mxu1 %v2610_v41 }
  0x55   :  { %873 = vmatpush.bf16.msrb.mxu2 %v2486_v31 }
  0x56   :  { %590 = vmatmul.bf16.gmra.mxu0 %v3463_v32  ;;  %922 = vmatpush.bf16.msrb.mxu3 %v2614_v37 }
  0x57   :  { %639 = vmatmul.bf16.gmra.mxu1 %v3465_v33 }
  0x58   :  { %688 = vmatmul.bf16.gmra.mxu2 %v3463_v32 }
  0x59   :  { %737 = vmatmul.bf16.gmra.mxu3 %v3465_v33  ;;  %2060 = vmatpush.bf16.msra.mxu2 %v2914_v50 }
  0x66   :  { %595 = vmatmul.bf16.gmra.mxu0 %v3471_v52 }
  0x67   :  { %644 = vmatmul.bf16.gmra.mxu1 %v3473_v53 }
  0x68   :  { %693 = vmatmul.bf16.gmra.mxu2 %v3471_v52 }
  0x69   :  { %742 = vmatmul.bf16.gmra.mxu3 %v3473_v53 }
  0x76   :  { %600 = vmatmul.bf16.gmra.mxu0 %v3479_v6 }
  0x77   :  { %649 = vmatmul.bf16.gmra.mxu1 %v3481_v7 }
  0x78   :  { %698 = vmatmul.bf16.gmra.mxu2 %v3479_v6 }
  0x79   :  { %747 = vmatmul.bf16.gmra.mxu3 %v3481_v7 }
  0x86   :  { %605 = vmatmul.bf16.gmra.mxu0 %v3487_v26 }
  0x87   :  { %654 = vmatmul.bf16.gmra.mxu1 %v3489_v27 }
  0x88   :  { %703 = vmatmul.bf16.gmra.mxu2 %v3487_v26 }
  0x89   :  { %752 = vmatmul.bf16.gmra.mxu3 %v3489_v27 }
  0x96   :  { %610 = vmatmul.bf16.gmra.mxu0 %v3495_v47 }
  0x97   :  { %659 = vmatmul.bf16.gmra.mxu1 %v3497_v48 }
  0x98   :  { %708 = vmatmul.bf16.gmra.mxu2 %v3495_v47 }
  0x99   :  { %757 = vmatmul.bf16.gmra.mxu3 %v3497_v48 }
  0xa6   :  { %615 = vmatmul.bf16.gmra.mxu0 %v3503_v56 }
  0xa7   :  { %664 = vmatmul.bf16.gmra.mxu1 %v3505_v57 }
  0xa8   :  { %713 = vmatmul.bf16.gmra.mxu2 %v3503_v56 }
  0xa9   :  { %762 = vmatmul.bf16.gmra.mxu3 %v3505_v57 }
  0xb3   :  { %v581_v60 = vpop.f32.mrf.mxu0 }
  0xb4   :  { %v582_v61 = vadd.f32 %v581_v60, %v3514_v59  ;;  %v630_v62 = vpop.f32.mrf.mxu1 }
  0xb6   :  { %v3517_v63 = vadd.f32 %v630_v62, %v582_v61  ;;  %776 = vmatmul.bf16.vlgmr.msrb.gmra.mxu0 %v3447_v44 }
  0xb7   :  { %825 = vmatmul.bf16.vlgmr.msrb.gmra.mxu1 %v3449_v49 }
  0xb8   :  { %874 = vmatmul.bf16.vlgmr.msrb.gmra.mxu2 %v3447_v44  ;;  %v964_v1 = vmul.f32 %v3517_v63, %v3517_v63 }
  0xb9   :  { %923 = vmatmul.bf16.vlgmr.msrb.gmra.mxu3 %v3449_v49 }
  0xba   :  { %v1028_v2 = vmul.f32 %v964_v1, %v3517_v63  ;;  %v3126_v1 = vld [vmem:[#allocation8 + $0x1f4] sm:$0xf0] }
  0xbb   :  { %v679_v3 = vpop.f32.mrf.mxu2  ;;  %v583_v8 = vpop.f32.mrf.mxu0 }
  0xbc   :  { %v680_v4 = vadd.f32 %v679_v3, %v3523_v0  ;;  %v728_v5 = vpop.f32.mrf.mxu3  ;;  %v1092_v9 = vmul.f32 0.044715, %v1028_v2  ;;  %v584_v10 = vadd.f32 %v583_v8, %v3514_v59  ;;  %v632_v11 = vpop.f32.mrf.mxu1 }
  0xbe   :  { %v3531_v44 = vadd.f32 %v728_v5, %v680_v4  ;;  %v1156_v12 = vadd.f32 %v1092_v9, %v3517_v63  ;;  %v3534_v13 = vadd.f32 %v632_v11, %v584_v10 }
  0xc0   :  { %v965_v49 = vmul.f32 %v3531_v44, %v3531_v44  ;;  %v1220_v16 = vmul.f32 0.7978846, %v1156_v12  ;;  %v968_v17 = vmul.f32 %v3534_v13, %v3534_v13 }
  0xc2   :  { %v1029_v18 = vmul.f32 %v965_v49, %v3531_v44  ;;  %v1032_v19 = vmul.f32 %v968_v17, %v3534_v13  ;;  %3136 = vtanh.f32 %v1220_v16 }
  0xc3   :  { %v681_v20 = vpop.f32.mrf.mxu2  ;;  %v586_v24 = vpop.f32.mrf.mxu0 }
  0xc4   :  { %v1093_v21 = vmul.f32 0.044715, %v1029_v18  ;;  %v682_v22 = vadd.f32 %v681_v20, %v3523_v0  ;;  %v730_v23 = vpop.f32.mrf.mxu3  ;;  %v1096_v25 = vmul.f32 0.044715, %v1032_v19  ;;  %v587_v28 = vadd.f32 %v586_v24, %v3514_v59  ;;  %v635_v29 = vpop.f32.mrf.mxu1  ;;  %v2849_v18 = vld [vmem:[#allocation8 + $0xf0] sm:$0xf] }
  0xc5   :  { %v3094_v19 = vld [vmem:[#allocation8 + $0xf4] sm:$0xf0] }
  0xc6   :  { %v1157_v30 = vadd.f32 %v1093_v21, %v3531_v44  ;;  %v3545_v31 = vadd.f32 %v730_v23, %v682_v22  ;;  %v1160_v34 = vadd.f32 %v1096_v25, %v3534_v13  ;;  %v3548_v35 = vadd.f32 %v635_v29, %v587_v28  ;;  %781 = vmatmul.bf16.gmra.mxu0 %v3455_v14 }
  0xc7   :  { %830 = vmatmul.bf16.gmra.mxu1 %v3457_v15  ;;  %v2850_v24 = vor.u32 %v3094_v19, %v2849_v18  ;;  %v2969_v18 = vld [vmem:[#allocation8 + $0x1e0] sm:$0xf] }
  0xc8   :  { %v1221_v36 = vmul.f32 0.7978846, %v1157_v30  ;;  %v969_v37 = vmul.f32 %v3545_v31, %v3545_v31  ;;  %879 = vmatmul.bf16.gmra.mxu2 %v3455_v14  ;;  %v1224_v38 = vmul.f32 0.7978846, %v1160_v34  ;;  %v972_v39 = vmul.f32 %v3548_v35, %v3548_v35  ;;  %v3137_v40 = vpop.eup %3136  ;;  %v2977_v14 = vld [vmem:[#allocation8 + $0x1f0] sm:$0xf] }
  0xc9   :  { %928 = vmatmul.bf16.gmra.mxu3 %v3457_v15  ;;  %v2786_v15 = vor.u32 %v3078_v54, %v2785_v51  ;;  %v1348_v2 = vadd.f32 1.0, %v3137_v40  ;;  %v2978_v8 = vor.u32 %v3126_v1, %v2977_v14  ;;  %2011 = vmatpush.bf16.msra.mxu1 %v2850_v24 }
  0xca   :  { %3138 = vtanh.f32 %v1221_v36  ;;  %v1033_v41 = vmul.f32 %v969_v37, %v3545_v31  ;;  %v1036_v45 = vmul.f32 %v972_v39, %v3548_v35 }
  0xcb   :  { %3140 = vtanh.f32 %v1224_v38  ;;  %v684_v46 = vpop.f32.mrf.mxu2  ;;  %v588_v62 = vpop.f32.mrf.mxu0  ;;  %1962 = vmatpush.bf16.msra.mxu0 %v2786_v15  ;;  %2109 = vmatpush.bf16.msra.mxu3 %v2978_v8  ;;  %v1412_v21 = vmul.f32 0.5, %v1348_v2  ;;  %v2777_v8 = vld [vmem:[#allocation8 + $0x60] sm:$0xf] }
  0xcc   :  { %v1097_v55 = vmul.f32 0.044715, %v1033_v41  ;;  %v685_v60 = vadd.f32 %v684_v46, %v3523_v0  ;;  %v733_v61 = vpop.f32.mrf.mxu3  ;;  %v1100_v3 = vmul.f32 0.044715, %v1036_v45  ;;  %v589_v4 = vadd.f32 %v588_v62, %v3514_v59  ;;  %v637_v5 = vpop.f32.mrf.mxu1 }
  0xcd   :  { %v1476_v41 = vmul.f32 %v1412_v21, %v3517_v63 }
  0xce   :  { %v1161_v9 = vadd.f32 %v1097_v55, %v3545_v31  ;;  %v3563_v10 = vadd.f32 %v733_v61, %v685_v60  ;;  %v1164_v11 = vadd.f32 %v1100_v3, %v3548_v35  ;;  %v3566_v12 = vadd.f32 %v637_v5, %v589_v4  ;;  %v2905_v4 = vld [vmem:[#allocation8 + $0x160] sm:$0xf]  ;;  %v3108_v5 = vld [vmem:[#allocation8 + $0x164] sm:$0xf0] }
  0xd0   :  { %v3139_v49 = vpop.eup %3138  ;;  %v1225_v16 = vmul.f32 0.7978846, %v1161_v9  ;;  %v973_v17 = vmul.f32 %v3563_v10, %v3563_v10  ;;  %v1228_v22 = vmul.f32 0.7978846, %v1164_v11  ;;  %v976_v23 = vmul.f32 %v3566_v12, %v3566_v12 }
  0xd1   :  { %v3141_v20 = vpop.eup %3140  ;;  %v1349_v25 = vadd.f32 1.0, %v3139_v49 }
  0xd2   :  { %v1352_v28 = vadd.f32 1.0, %v3141_v20  ;;  %3142 = vtanh.f32 %v1225_v16  ;;  %v1037_v29 = vmul.f32 %v973_v17, %v3563_v10  ;;  %v1040_v30 = vmul.f32 %v976_v23, %v3566_v12  ;;  %v3076_v17 = vld [vmem:[#allocation8 + $0x64] sm:$0xf0] }
  0xd3   :  { %v686_v34 = vpop.f32.mrf.mxu2  ;;  %v591_v40 = vpop.f32.mrf.mxu0  ;;  %3144 = vtanh.f32 %v1228_v22  ;;  %v1413_v46 = vmul.f32 0.5, %v1349_v25  ;;  %v2778_v21 = vor.u32 %v3076_v17, %v2777_v8  ;;  %v3124_v22 = vld [vmem:[#allocation8 + $0x1e4] sm:$0xf0] }
  0xd4   :  { %v1416_v36 = vmul.f32 0.5, %v1352_v28  ;;  %v1101_v37 = vmul.f32 0.044715, %v1037_v29  ;;  %v687_v38 = vadd.f32 %v686_v34, %v3523_v0  ;;  %v735_v39 = vpop.f32.mrf.mxu3  ;;  %v1104_v42 = vmul.f32 0.044715, %v1040_v30  ;;  %v640_v45 = vpop.f32.mrf.mxu1 }
  0xd5   :  { %v592_v43 = vadd.f32 %v591_v40, %v3514_v59  ;;  %v1477_v2 = vmul.f32 %v1413_v46, %v3531_v44  ;;  %v2970_v29 = vor.u32 %v3124_v22, %v2969_v18  ;;  %1963 = vmatpush.bf16.msra.mxu0 %v2778_v21 }
  0xd6   :  { %v1480_v50 = vmul.f32 %v1416_v36, %v3534_v13  ;;  %v1165_v51 = vadd.f32 %v1101_v37, %v3563_v10  ;;  %v3579_v54 = vadd.f32 %v735_v39, %v687_v38  ;;  %v1168_v14 = vadd.f32 %v1104_v42, %v3566_v12  ;;  %786 = vmatmul.bf16.gmra.mxu0 %v3463_v32  ;;  %v3092_v42 = vld [vmem:[#allocation8 + $0xe4] sm:$0xf0] }
  0xd7   :  { %v3582_v55 = vadd.f32 %v640_v45, %v592_v43  ;;  %835 = vmatmul.bf16.gmra.mxu1 %v3465_v33  ;;  %2110 = vmatpush.bf16.msra.mxu3 %v2970_v29  ;;  %v2769_v29 = vld [vmem:[#allocation8 + $0x50] sm:$0xf] }
  0xd8   :  { %v3143_v60 = vpop.eup %3142  ;;  %v3585_v63 = vpack.c.bf16 %v1480_v50, %v1476_v41  ;;  %v1229_v61 = vmul.f32 0.7978846, %v1165_v51  ;;  %v977_v62 = vmul.f32 %v3579_v54, %v3579_v54  ;;  %884 = vmatmul.bf16.gmra.mxu2 %v3463_v32  ;;  %v1232_v15 = vmul.f32 0.7978846, %v1168_v14  ;;  %v2841_v41 = vld [vmem:[#allocation8 + $0xe0] sm:$0xf] }
  0xd9   :  { %v1353_v13 = vadd.f32 1.0, %v3143_v60  ;;  %v980_v1 = vmul.f32 %v3582_v55, %v3582_v55  ;;  %933 = vmatmul.bf16.gmra.mxu3 %v3465_v33  ;;  %v3145_v9 = vpop.eup %3144  ;;  %v2906_v32 = vor.u32 %v3108_v5, %v2905_v4  ;;  %v2842_v50 = vor.u32 %v3092_v42, %v2841_v41  ;;  %v3122_v41 = vld [vmem:[#allocation8 + $0x1d4] sm:$0xf0] }
  0xda   :  { %v1041_v3 = vmul.f32 %v977_v62, %v3579_v54  ;;  %3146 = vtanh.f32 %v1232_v15  ;;  %v1356_v36 = vadd.f32 1.0, %v3145_v9 }
  0xdb   :  { %v1417_v11 = vmul.f32 0.5, %v1353_v13  ;;  %v1044_v49 = vmul.f32 %v980_v1, %v3582_v55  ;;  %v689_v16 = vpop.f32.mrf.mxu2  ;;  %3148 = vtanh.f32 %v1229_v61  ;;  %v593_v44 = vpop.f32.mrf.mxu0  ;;  %2061 = vmatpush.bf16.msra.mxu2 %v2906_v32  ;;  %2012 = vmatpush.bf16.msra.mxu1 %v2842_v50 }
  0xdc   :  { %v1105_v19 = vmul.f32 0.044715, %v1041_v3  ;;  %v690_v33 = vadd.f32 %v689_v16, %v3523_v0  ;;  %v738_v20 = vpop.f32.mrf.mxu3  ;;  %v594_v25 = vadd.f32 %v593_v44, %v3514_v59  ;;  %v642_v28 = vpop.f32.mrf.mxu1  ;;  %v1420_v61 = vmul.f32 0.5, %v1356_v36 }
  0xdd   :  { %v1481_v23 = vmul.f32 %v1417_v11, %v3545_v31  ;;  %v1108_v24 = vmul.f32 0.044715, %v1044_v49 }
  0xde   :  { %v1169_v30 = vadd.f32 %v1105_v19, %v3579_v54  ;;  %v3601_v34 = vadd.f32 %v738_v20, %v690_v33  ;;  %v3606_v39 = vadd.f32 %v642_v28, %v594_v25  ;;  %v1484_v32 = vmul.f32 %v1420_v61, %v3548_v35  ;;  %v2897_v25 = vld [vmem:[#allocation8 + $0x150] sm:$0xf]  ;;  %v3106_v28 = vld [vmem:[#allocation8 + $0x154] sm:$0xf0] }
  0xdf   :  { %v3603_v37 = vpack.c.bf16 %v1481_v23, %v1477_v2  ;;  %v1172_v38 = vadd.f32 %v1108_v24, %v3582_v55 }
  0xe0   :  { %v1233_v31 = vmul.f32 0.7978846, %v1169_v30  ;;  %v981_v40 = vmul.f32 %v3601_v34, %v3601_v34  ;;  %v3147_v43 = vpop.eup %3146  ;;  %v984_v46 = vmul.f32 %v3606_v39, %v3606_v39 }
  0xe1   :  { %v1236_v45 = vmul.f32 0.7978846, %v1172_v38  ;;  %v3149_v51 = vpop.eup %3148  ;;  %v1360_v60 = vadd.f32 1.0, %v3147_v43  ;;  %v2898_v38 = vor.u32 %v3106_v28, %v2897_v25 }
  0xe2   :  { %v1045_v14 = vmul.f32 %v981_v40, %v3601_v34  ;;  %3150 = vtanh.f32 %v1233_v31  ;;  %v1048_v62 = vmul.f32 %v984_v46, %v3606_v39  ;;  %v1357_v11 = vadd.f32 1.0, %v3149_v51  ;;  %v3074_v31 = vld [vmem:[#allocation8 + $0x54] sm:$0xf0]  ;;  %v2961_v40 = vld [vmem:[#allocation8 + $0x1d0] sm:$0xf] }
  0xe3   :  { %v691_v13 = vpop.f32.mrf.mxu2  ;;  %v596_v3 = vpop.f32.mrf.mxu0  ;;  %v1424_v4 = vmul.f32 0.5, %v1360_v60  ;;  %3152 = vtanh.f32 %v1236_v45  ;;  %v2770_v46 = vor.u32 %v3074_v31, %v2769_v29  ;;  %v2962_v50 = vor.u32 %v3122_v41, %v2961_v40  ;;  %2062 = vmatpush.bf16.msra.mxu2 %v2898_v38 }
  0xe4   :  { %v1109_v15 = vmul.f32 0.044715, %v1045_v14  ;;  %v692_v1 = vadd.f32 %v691_v13, %v3523_v0  ;;  %v740_v2 = vpop.f32.mrf.mxu3  ;;  %v1112_v5 = vmul.f32 0.044715, %v1048_v62  ;;  %v597_v8 = vadd.f32 %v596_v3, %v3514_v59  ;;  %v645_v9 = vpop.f32.mrf.mxu1 }
  0xe5   :  { %v1488_v17 = vmul.f32 %v1424_v4, %v3566_v12  ;;  %v1421_v23 = vmul.f32 0.5, %v1357_v11  ;;  %1964 = vmatpush.bf16.msra.mxu0 %v2770_v46  ;;  %2111 = vmatpush.bf16.msra.mxu3 %v2962_v50  ;;  %v2833_v11 = vld [vmem:[#allocation8 + $0xd0] sm:$0xf] }
  0xe6   :  { %v1173_v49 = vadd.f32 %v1109_v15, %v3601_v34  ;;  %v3617_v16 = vadd.f32 %v740_v2, %v692_v1  ;;  %v1176_v18 = vadd.f32 %v1112_v5, %v3606_v39  ;;  %v3622_v19 = vadd.f32 %v645_v9, %v597_v8  ;;  %791 = vmatmul.bf16.gmra.mxu0 %v3471_v52 }
  0xe7   :  { %840 = vmatmul.bf16.gmra.mxu1 %v3473_v53  ;;  %v3629_v21 = vpack.c.bf16 %v1488_v17, %v1484_v32  ;;  %v1485_v3 = vmul.f32 %v1421_v23, %v3563_v10 }
  0xe8   :  { %v3151_v33 = vpop.eup %3150  ;;  %v1237_v20 = vmul.f32 0.7978846, %v1173_v49  ;;  %v985_v44 = vmul.f32 %v3617_v16, %v3617_v16  ;;  %889 = vmatmul.bf16.gmra.mxu2 %v3471_v52  ;;  %v1240_v35 = vmul.f32 0.7978846, %v1176_v18  ;;  %v988_v12 = vmul.f32 %v3622_v19, %v3622_v19  ;;  %v3090_v49 = vld [vmem:[#allocation8 + $0xd4] sm:$0xf0] }
  0xe9   :  { %938 = vmatmul.bf16.gmra.mxu3 %v3473_v53  ;;  %v1361_v22 = vadd.f32 1.0, %v3151_v33  ;;  %v3153_v30 = vpop.eup %3152  ;;  %v2834_v33 = vor.u32 %v3090_v49, %v2833_v11 }
  0xea   :  { %3154 = vtanh.f32 %v1237_v20  ;;  %v1049_v24 = vmul.f32 %v985_v44, %v3617_v16  ;;  %v1052_v36 = vmul.f32 %v988_v12, %v3622_v19  ;;  %v1364_v15 = vadd.f32 1.0, %v3153_v30 }
  0xeb   :  { %v694_v52 = vpop.f32.mrf.mxu2  ;;  %3156 = vtanh.f32 %v1240_v35  ;;  %v598_v45 = vpop.f32.mrf.mxu0  ;;  %v1425_v61 = vmul.f32 0.5, %v1361_v22  ;;  %2013 = vmatpush.bf16.msra.mxu1 %v2834_v33 }
  0xec   :  { %v1113_v42 = vmul.f32 0.044715, %v1049_v24  ;;  %v695_v53 = vadd.f32 %v694_v52, %v3523_v0  ;;  %v743_v43 = vpop.f32.mrf.mxu3  ;;  %v1116_v51 = vmul.f32 0.044715, %v1052_v36  ;;  %v599_v14 = vadd.f32 %v598_v45, %v3514_v59  ;;  %v647_v60 = vpop.f32.mrf.mxu1 }
  0xed   :  { %v1489_v4 = vmul.f32 %v1425_v61, %v3579_v54  ;;  %v1428_v35 = vmul.f32 0.5, %v1364_v15  ;;  %v2889_v61 = vld [vmem:[#allocation8 + $0x140] sm:$0xf] }
  0xee   :  { %v1177_v62 = vadd.f32 %v1113_v42, %v3617_v16  ;;  %v3639_v13 = vadd.f32 %v743_v43, %v695_v53  ;;  %v1180_v1 = vadd.f32 %v1116_v51, %v3622_v19  ;;  %v3642_v2 = vadd.f32 %v647_v60, %v599_v14  ;;  %v2761_v15 = vld [vmem:[#allocation8 + $0x40] sm:$0xf] }
  0xef   :  { %v3650_v20 = vpack.c.bf16 %v1489_v4, %v1485_v3  ;;  %v1492_v40 = vmul.f32 %v1428_v35, %v3582_v55 }
  0xf0   :  { %v3155_v5 = vpop.eup %3154  ;;  %v1241_v8 = vmul.f32 0.7978846, %v1177_v62  ;;  %v989_v9 = vmul.f32 %v3639_v13, %v3639_v13  ;;  %v1244_v17 = vmul.f32 0.7978846, %v1180_v1  ;;  %v992_v18 = vmul.f32 %v3642_v2, %v3642_v2  ;;  %v3104_v62 = vld [vmem:[#allocation8 + $0x144] sm:$0xf0] }
  0xf1   :  { %v3157_v32 = vpop.eup %3156  ;;  %v1365_v52 = vadd.f32 1.0, %v3155_v5  ;;  %v2890_v4 = vor.u32 %v3104_v62, %v2889_v61  ;;  %v3072_v5 = vld [vmem:[#allocation8 + $0x44] sm:$0xf0] }
  0xf2   :  { %v1053_v44 = vmul.f32 %v989_v9, %v3639_v13  ;;  %v1368_v10 = vadd.f32 1.0, %v3157_v32  ;;  %3158 = vtanh.f32 %v1241_v8  ;;  %v1056_v54 = vmul.f32 %v992_v18, %v3642_v2  ;;  %v2953_v8 = vld [vmem:[#allocation8 + $0x1c0] sm:$0xf]  ;;  %v3120_v9 = vld [vmem:[#allocation8 + $0x1c4] sm:$0xf0] }
  0xf3   :  { %v696_v12 = vpop.f32.mrf.mxu2  ;;  %v601_v25 = vpop.f32.mrf.mxu0  ;;  %3160 = vtanh.f32 %v1244_v17  ;;  %v1429_v14 = vmul.f32 0.5, %v1365_v52  ;;  %v2762_v17 = vor.u32 %v3072_v5, %v2761_v15  ;;  %v2954_v18 = vor.u32 %v3120_v9, %v2953_v8  ;;  %2063 = vmatpush.bf16.msra.mxu2 %v2890_v4  ;;  %v3088_v52 = vld [vmem:[#allocation8 + $0xc4] sm:$0xf0]  ;;  %v2753_v4 = vld [vmem:[#allocation8 + $0x30] sm:$0xf] }
  0xf4   :  { %v1117_v22 = vmul.f32 0.044715, %v1053_v44  ;;  %v697_v23 = vadd.f32 %v696_v12, %v3523_v0  ;;  %v745_v24 = vpop.f32.mrf.mxu3  ;;  %v1432_v28 = vmul.f32 0.5, %v1368_v10  ;;  %v1120_v29 = vmul.f32 0.044715, %v1056_v54  ;;  %v650_v36 = vpop.f32.mrf.mxu1 }
  0xf5   :  { %v602_v30 = vadd.f32 %v601_v25, %v3514_v59  ;;  %1965 = vmatpush.bf16.msra.mxu0 %v2762_v17  ;;  %2112 = vmatpush.bf16.msra.mxu3 %v2954_v18  ;;  %v1493_v25 = vmul.f32 %v1429_v14, %v3601_v34  ;;  %v3070_v5 = vld [vmem:[#allocation8 + $0x34] sm:$0xf0]  ;;  %v2817_v8 = vld [vmem:[#allocation8 + $0xb0] sm:$0xf] }
  0xf6   :  { %v1181_v38 = vadd.f32 %v1117_v22, %v3639_v13  ;;  %v3657_v31 = vadd.f32 %v745_v24, %v697_v23  ;;  %v1496_v41 = vmul.f32 %v1432_v28, %v3606_v39  ;;  %v1184_v42 = vadd.f32 %v1120_v29, %v3642_v2  ;;  %796 = vmatmul.bf16.gmra.mxu0 %v3479_v6 }
  0xf7   :  { %v3662_v53 = vadd.f32 %v650_v36, %v602_v30  ;;  %845 = vmatmul.bf16.gmra.mxu1 %v3481_v7  ;;  %v2825_v36 = vld [vmem:[#allocation8 + $0xc0] sm:$0xf] }
  0xf8   :  { %v3159_v43 = vpop.eup %3158  ;;  %v1245_v45 = vmul.f32 0.7978846, %v1181_v38  ;;  %v993_v46 = vmul.f32 %v3657_v31, %v3657_v31  ;;  %894 = vmatmul.bf16.gmra.mxu2 %v3479_v6  ;;  %v3669_v50 = vpack.c.bf16 %v1496_v41, %v1492_v40  ;;  %v1248_v55 = vmul.f32 0.7978846, %v1184_v42 }
  0xf9   :  { %v996_v39 = vmul.f32 %v3662_v53, %v3662_v53  ;;  %943 = vmatmul.bf16.gmra.mxu3 %v3481_v7  ;;  %v1369_v51 = vadd.f32 1.0, %v3159_v43  ;;  %v3161_v1 = vpop.eup %3160  ;;  %v2826_v42 = vor.u32 %v3088_v52, %v2825_v36 }
  0xfa   :  { %3162 = vtanh.f32 %v1245_v45  ;;  %v1057_v60 = vmul.f32 %v993_v46, %v3657_v31  ;;  %v1372_v22 = vadd.f32 1.0, %v3161_v1 }
  0xfb   :  { %v1060_v3 = vmul.f32 %v996_v39, %v3662_v53  ;;  %v699_v6 = vpop.f32.mrf.mxu2  ;;  %3164 = vtanh.f32 %v1248_v55  ;;  %v603_v32 = vpop.f32.mrf.mxu0  ;;  %v1433_v35 = vmul.f32 0.5, %v1369_v51  ;;  %2014 = vmatpush.bf16.msra.mxu1 %v2826_v42 }
  0xfc   :  { %v1121_v11 = vmul.f32 0.044715, %v1057_v60  ;;  %v700_v7 = vadd.f32 %v699_v6, %v3523_v0  ;;  %v748_v49 = vpop.f32.mrf.mxu3  ;;  %v604_v44 = vadd.f32 %v603_v32, %v3514_v59  ;;  %v652_v10 = vpop.f32.mrf.mxu1  ;;  %v1436_v46 = vmul.f32 0.5, %v1372_v22 }
  0xfd   :  { %v1124_v33 = vmul.f32 0.044715, %v1060_v3  ;;  %v1497_v28 = vmul.f32 %v1433_v35, %v3617_v16 }
  0xfe   :  { %v1185_v54 = vadd.f32 %v1121_v11, %v3657_v31  ;;  %v3679_v12 = vadd.f32 %v748_v49, %v700_v7  ;;  %v3682_v24 = vadd.f32 %v652_v10, %v604_v44  ;;  %v1500_v15 = vmul.f32 %v1436_v46, %v3622_v19  ;;  %v3086_v7 = vld [vmem:[#allocation8 + $0xb4] sm:$0xf0]  ;;  %v2945_v10 = vld [vmem:[#allocation8 + $0x1b0] sm:$0xf] }
  0xff   :  { %v1188_v23 = vadd.f32 %v1124_v33, %v3662_v53  ;;  %v3688_v43 = vpack.c.bf16 %v1497_v28, %v1493_v25  ;;  %v2754_v11 = vor.u32 %v3070_v5, %v2753_v4  ;;  %v2818_v17 = vor.u32 %v3086_v7, %v2817_v8  ;;  %v2881_v33 = vld [vmem:[#allocation8 + $0x130] sm:$0xf]  ;;  %v3102_v44 = vld [vmem:[#allocation8 + $0x134] sm:$0xf0]  ;;  %v2745_v25 = vld [vmem:[#allocation8 + $0x20] sm:$0xf] }
 0x100   :  { %v3163_v29 = vpop.eup %3162  ;;  %v1249_v30 = vmul.f32 0.7978846, %v1185_v54  ;;  %v1000_v41 = vmul.f32 %v3682_v24, %v3682_v24  ;;  %v2882_v22 = vor.u32 %v3102_v44, %v2881_v33  ;;  %v3068_v28 = vld [vmem:[#allocation8 + $0x24] sm:$0xf0]  ;;  %v3082_v5 = vld [vmem:[#allocation8 + $0x94] sm:$0xf0] }
 0x101   :  { %v3165_v38 = vpop.eup %3164  ;;  %v1252_v40 = vmul.f32 0.7978846, %v1188_v23  ;;  %v1373_v14 = vadd.f32 1.0, %v3163_v29  ;;  %1966 = vmatpush.bf16.msra.mxu0 %v2754_v11  ;;  %v3118_v23 = vld [vmem:[#allocation8 + $0x1b4] sm:$0xf0]  ;;  %2015 = vmatpush.bf16.msra.mxu1 %v2818_v17  ;;  %v2746_v52 = vor.u32 %v3068_v28, %v2745_v25 }
 0x102   :  { %v1376_v45 = vadd.f32 1.0, %v3165_v38  ;;  %3166 = vtanh.f32 %v1249_v30  ;;  %v1064_v55 = vmul.f32 %v1000_v41, %v3682_v24  ;;  %v2946_v36 = vor.u32 %v3118_v23, %v2945_v10  ;;  %v2809_v38 = vld [vmem:[#allocation8 + $0xa0] sm:$0xf]  ;;  %2064 = vmatpush.bf16.msra.mxu2 %v2882_v22 }
 0x103   :  { %v3691_v34 = vpop.f32.mrf.mxu2  ;;  %v606_v39 = vpop.f32.mrf.mxu0  ;;  %3168 = vtanh.f32 %v1252_v40  ;;  %v1437_v19 = vmul.f32 0.5, %v1373_v14  ;;  %v3084_v40 = vld [vmem:[#allocation8 + $0xa4] sm:$0xf0] }
 0x104   :  { %v3693_v16 = vpop.f32.mrf.mxu3  ;;  %v1440_v51 = vmul.f32 0.5, %v1376_v45  ;;  %v1128_v60 = vmul.f32 0.044715, %v1064_v55  ;;  %v607_v61 = vadd.f32 %v606_v39, %v3514_v59  ;;  %v655_v62 = vpop.f32.mrf.mxu1  ;;  %v2810_v46 = vor.u32 %v3084_v40, %v2809_v38  ;;  %2113 = vmatpush.bf16.msra.mxu3 %v2946_v36 }
 0x105   :  { %1967 = vmatpush.bf16.msra.mxu0 %v2746_v52 }
 0x106   :  { %v1504_v1 = vmul.f32 %v1440_v51, %v3642_v2  ;;  %v1192_v3 = vadd.f32 %v1128_v60, %v3682_v24  ;;  %v3699_v6 = vadd.f32 %v655_v62, %v607_v61  ;;  %801 = vmatmul.bf16.gmra.mxu0 %v3487_v26  ;;  %2016 = vmatpush.bf16.msra.mxu1 %v2810_v46  ;;  %v2737_v61 = vld [vmem:[#allocation8 + $0x10] sm:$0xf]  ;;  %v3066_v62 = vld [vmem:[#allocation8 + $0x14] sm:$0xf0] }
 0x107   :  { %850 = vmatmul.bf16.gmra.mxu1 %v3489_v27  ;;  %v2738_v4 = vor.u32 %v3066_v62, %v2737_v61 }
 0x108   :  { %v3167_v9 = vpop.eup %3166  ;;  %899 = vmatmul.bf16.gmra.mxu2 %v3487_v26  ;;  %v3704_v49 = vpack.c.bf16 %v1504_v1, %v1500_v15  ;;  %v1256_v2 = vmul.f32 0.7978846, %v1192_v3  ;;  %v1004_v32 = vmul.f32 %v3699_v6, %v3699_v6  ;;  %v2801_v15 = vld [vmem:[#allocation8 + $0x90] sm:$0xf]  ;;  %v1501_v1 = vmul.f32 %v1437_v19, %v3639_v13  ;;  %v2729_v13 = vld [vmem:[#allocation8] sm:$0xf] }
 0x109   :  { %948 = vmatmul.bf16.gmra.mxu3 %v3489_v27  ;;  %v1377_v18 = vadd.f32 1.0, %v3167_v9  ;;  %v3169_v35 = vpop.eup %3168  ;;  %v2802_v11 = vor.u32 %v3082_v5, %v2801_v15  ;;  %1968 = vmatpush.bf16.msra.mxu0 %v2738_v4  ;;  %v2793_v19 = vld [vmem:[#allocation8 + $0x80] sm:$0xf] }
 0x10a   :  { %v1068_v26 = vmul.f32 %v1004_v32, %v3699_v6  ;;  %3170 = vtanh.f32 %v1256_v2  ;;  %v1380_v51 = vadd.f32 1.0, %v3169_v35 }
 0x10b   :  { %v704_v54 = vpop.f32.mrf.mxu2  ;;  %v608_v27 = vpop.f32.mrf.mxu0  ;;  %v1441_v55 = vmul.f32 0.5, %v1377_v18  ;;  %2017 = vmatpush.bf16.msra.mxu1 %v2802_v11 }
 0x10c   :  { %v705_v29 = vadd.f32 %v704_v54, %v3523_v0  ;;  %v753_v30 = vpop.f32.mrf.mxu3  ;;  %v1132_v41 = vmul.f32 0.044715, %v1068_v26  ;;  %v609_v42 = vadd.f32 %v608_v27, %v3514_v59  ;;  %v657_v45 = vpop.f32.mrf.mxu1  ;;  %v1444_v17 = vmul.f32 0.5, %v1380_v51  ;;  %v3080_v26 = vld [vmem:[#allocation8 + $0x84] sm:$0xf0] }
 0x10d   :  { %v1505_v3 = vmul.f32 %v1441_v55, %v3657_v31  ;;  %v3064_v31 = vld [vmem:[#allocation8 + $0x4] sm:$0xf0]  ;;  %v2794_v28 = vor.u32 %v3080_v26, %v2793_v19 }
 0x10e   :  { %v3712_v39 = vadd.f32 %v753_v30, %v705_v29  ;;  %v1196_v14 = vadd.f32 %v1132_v41, %v3699_v6  ;;  %v3715_v60 = vadd.f32 %v657_v45, %v609_v42  ;;  %v2730_v35 = vor.u32 %v3064_v31, %v2729_v13  ;;  %v2937_v41 = vld [vmem:[#allocation8 + $0x1a0] sm:$0xf]  ;;  %v3116_v55 = vld [vmem:[#allocation8 + $0x1a4] sm:$0xf0] }
 0x10f   :  { %v3721_v7 = vpack.c.bf16 %v1505_v3, %v1501_v1  ;;  %v1508_v29 = vmul.f32 %v1444_v17, %v3662_v53  ;;  %2018 = vmatpush.bf16.msra.mxu1 %v2794_v28  ;;  %v2873_v53 = vld [vmem:[#allocation8 + $0x120] sm:$0xf]  ;;  %v2938_v62 = vor.u32 %v3116_v55, %v2937_v41  ;;  %v997_v55 = vmul.f32 %v3679_v12, %v3679_v12 }
 0x110   :  { %v3171_v8 = vpop.eup %3170  ;;  %v1008_v9 = vmul.f32 %v3715_v60, %v3715_v60  ;;  %v1260_v2 = vmul.f32 0.7978846, %v1196_v14  ;;  %1969 = vmatpush.bf16.msra.mxu0 %v2730_v35 }
 0x111   :  { %v1384_v32 = vadd.f32 1.0, %v3171_v8  ;;  %2114 = vmatpush.bf16.msra.mxu3 %v2938_v62 }
 0x112   :  { %v1072_v18 = vmul.f32 %v1008_v9, %v3715_v60  ;;  %3172 = vtanh.f32 %v1260_v2 }
 0x113   :  { %v3724_v33 = vpop.f32.mrf.mxu2  ;;  %v611_v10 = vpop.f32.mrf.mxu0  ;;  %v1448_v54 = vmul.f32 0.5, %v1384_v32 }
 0x114   :  { %v3726_v44 = vpop.f32.mrf.mxu3  ;;  %v1136_v22 = vmul.f32 0.044715, %v1072_v18  ;;  %v612_v23 = vadd.f32 %v611_v10, %v3514_v59  ;;  %v660_v25 = vpop.f32.mrf.mxu1 }
 0x115   :  { %v1512_v30 = vmul.f32 %v1448_v54, %v3682_v24  ;;  %v3100_v24 = vld [vmem:[#allocation8 + $0x124] sm:$0xf0] }
 0x116   :  { %v1200_v27 = vadd.f32 %v1136_v22, %v3715_v60  ;;  %v3732_v36 = vadd.f32 %v660_v25, %v612_v23  ;;  %806 = vmatmul.bf16.gmra.mxu0 %v3495_v47  ;;  %v2874_v46 = vor.u32 %v3100_v24, %v2873_v53 }
 0x117   :  { %855 = vmatmul.bf16.gmra.mxu1 %v3497_v48  ;;  %v3737_v52 = vpack.c.bf16 %v1512_v30, %v1508_v29 }
 0x118   :  { %904 = vmatmul.bf16.gmra.mxu2 %v3495_v47  ;;  %v1264_v38 = vmul.f32 0.7978846, %v1200_v27  ;;  %v1012_v40 = vmul.f32 %v3732_v36, %v3732_v36  ;;  %v3173_v51 = vpop.eup %3172 }
 0x119   :  { %953 = vmatmul.bf16.gmra.mxu3 %v3497_v48  ;;  %2065 = vmatpush.bf16.msra.mxu2 %v2874_v46  ;;  %v1388_v8 = vadd.f32 1.0, %v3173_v51 }
 0x11a   :  { %v1076_v42 = vmul.f32 %v1012_v40, %v3732_v36  ;;  %3174 = vtanh.f32 %v1264_v38  ;;  %v702_v40 = vadd.f32 %v3691_v34, %v3523_v0 }
 0x11b   :  { %v709_v45 = vpop.f32.mrf.mxu2  ;;  %v613_v61 = vpop.f32.mrf.mxu0  ;;  %v1452_v13 = vmul.f32 0.5, %v1388_v8  ;;  %v1061_v8 = vmul.f32 %v997_v55, %v3679_v12 }
 0x11c   :  { %v710_v14 = vadd.f32 %v709_v45, %v3523_v0  ;;  %v758_v47 = vpop.f32.mrf.mxu3  ;;  %v1140_v15 = vmul.f32 0.044715, %v1076_v42  ;;  %v614_v1 = vadd.f32 %v613_v61, %v3514_v59  ;;  %v662_v3 = vpop.f32.mrf.mxu1  ;;  %v3781_v34 = vadd.f32 %v3693_v16, %v702_v40 }
 0x11d   :  { %v1516_v25 = vmul.f32 %v1452_v13, %v3699_v6 }
 0x11e   :  { %v3745_v48 = vadd.f32 %v758_v47, %v710_v14  ;;  %v1204_v4 = vadd.f32 %v1140_v15, %v3732_v36  ;;  %v3748_v5 = vadd.f32 %v662_v3, %v614_v1  ;;  %v2865_v15 = vld [vmem:[#allocation8 + $0x110] sm:$0xf]  ;;  %v3098_v1 = vld [vmem:[#allocation8 + $0x114] sm:$0xf0]  ;;  %v1001_v16 = vmul.f32 %v3781_v34, %v3781_v34 }
 0x120   :  { %v1268_v9 = vmul.f32 0.7978846, %v1204_v4  ;;  %v1016_v11 = vmul.f32 %v3748_v5, %v3748_v5  ;;  %v3175_v2 = vpop.eup %3174 }
 0x121   :  { %v1392_v18 = vadd.f32 1.0, %v3175_v2  ;;  %v2866_v2 = vor.u32 %v3098_v1, %v2865_v15 }
 0x122   :  { %v1080_v32 = vmul.f32 %v1016_v11, %v3748_v5  ;;  %3176 = vtanh.f32 %v1268_v9 }
 0x123   :  { %v3753_v17 = vpop.f32.mrf.mxu2  ;;  %v616_v19 = vpop.f32.mrf.mxu0  ;;  %v1456_v54 = vmul.f32 0.5, %v1392_v18  ;;  %2066 = vmatpush.bf16.msra.mxu2 %v2866_v2 }
 0x124   :  { %v3755_v31 = vpop.f32.mrf.mxu3  ;;  %v1144_v10 = vmul.f32 0.044715, %v1080_v32  ;;  %v617_v35 = vadd.f32 %v616_v19, %v3514_v59  ;;  %v665_v26 = vpop.f32.mrf.mxu1 }
 0x125   :  { %v1520_v28 = vmul.f32 %v1456_v54, %v3715_v60  ;;  %v1125_v54 = vmul.f32 0.044715, %v1061_v8  ;;  %v3112_v8 = vld [vmem:[#allocation8 + $0x184] sm:$0xf0] }
 0x126   :  { %v1208_v22 = vadd.f32 %v1144_v10, %v3748_v5  ;;  %v3759_v23 = vadd.f32 %v665_v26, %v617_v35  ;;  %811 = vmatmul.bf16.gmra.mxu0 %v3503_v56 }
 0x127   :  { %860 = vmatmul.bf16.gmra.mxu1 %v3505_v57  ;;  %v3769_v27 = vpack.c.bf16 %v1520_v28, %v1516_v25 }
 0x128   :  { %909 = vmatmul.bf16.gmra.mxu2 %v3503_v56  ;;  %v1272_v29 = vmul.f32 0.7978846, %v1208_v22  ;;  %v1020_v30 = vmul.f32 %v3759_v23, %v3759_v23  ;;  %v3177_v38 = vpop.eup %3176  ;;  %v1065_v22 = vmul.f32 %v1001_v16, %v3781_v34 }
 0x129   :  { %958 = vmatmul.bf16.gmra.mxu3 %v3505_v57  ;;  %v1396_v57 = vadd.f32 1.0, %v3177_v38  ;;  %v3264_v38 = vld [vmem:[#allocation7] sm:$0xf] }
 0x12a   :  { %v1084_v6 = vmul.f32 %v1020_v30, %v3759_v23  ;;  %3178 = vtanh.f32 %v1272_v29  ;;  %v2857_v29 = vld [vmem:[#allocation8 + $0x100] sm:$0xf]  ;;  %v3096_v30 = vld [vmem:[#allocation8 + $0x104] sm:$0xf0]  ;;  %v3808_v40 = vperm.slane %v3264_v38, 3 }
 0x12b   :  { %v714_v53 = vpop.f32.mrf.mxu2  ;;  %v618_v56 = vpop.f32.mrf.mxu0  ;;  %v1460_v4 = vmul.f32 0.5, %v1396_v57  ;;  %v1129_v57 = vmul.f32 0.044715, %v1065_v22 }
 0x12c   :  { %v715_v60 = vadd.f32 %v714_v53, %v3523_v0  ;;  %v763_v24 = vpop.f32.mrf.mxu3  ;;  %v1148_v41 = vmul.f32 0.044715, %v1084_v6  ;;  %v619_v42 = vadd.f32 %v618_v56, %v3514_v59  ;;  %v667_v45 = vpop.f32.mrf.mxu1  ;;  %v3789_v59 = vperm.slane %v3511_v58, 2  ;;  %v2929_v6 = vld [vmem:[#allocation8 + $0x190] sm:$0xf] }
 0x12d   :  { %v1524_v35 = vmul.f32 %v1460_v4, %v3732_v36  ;;  %v3114_v36 = vld [vmem:[#allocation8 + $0x194] sm:$0xf0]  ;;  %v2858_v53 = vor.u32 %v3096_v30, %v2857_v29  ;;  %v2921_v4 = vld [vmem:[#allocation8 + $0x180] sm:$0xf] }
 0x12e   :  { %v3776_v46 = vadd.f32 %v763_v24, %v715_v60  ;;  %v1212_v51 = vadd.f32 %v1148_v41, %v3759_v23  ;;  %v3784_v14 = vadd.f32 %v667_v45, %v619_v42  ;;  %v707_v60 = vadd.f32 %v3724_v33, %v3523_v0 }
 0x12f   :  { %v2930_v41 = vor.u32 %v3114_v36, %v2929_v6  ;;  %2067 = vmatpush.bf16.msra.mxu2 %v2858_v53  ;;  %v1189_v45 = vadd.f32 %v1125_v54, %v3679_v12 }
 0x130   :  { %v3179_v47 = vpop.eup %3178  ;;  %v1276_v61 = vmul.f32 0.7978846, %v1212_v51  ;;  %v1024_v62 = vmul.f32 %v3784_v14, %v3784_v14  ;;  %v3820_v33 = vadd.f32 %v3726_v44, %v707_v60  ;;  %v1005_v44 = vmul.f32 %v3712_v39, %v3712_v39 }
 0x131   :  { %v1400_v3 = vadd.f32 1.0, %v3179_v47  ;;  %2115 = vmatpush.bf16.msra.mxu3 %v2930_v41 }
 0x132   :  { %v1088_v9 = vmul.f32 %v1024_v62, %v3784_v14  ;;  %3180 = vtanh.f32 %v1276_v61  ;;  %v1069_v53 = vmul.f32 %v1005_v44, %v3712_v39  ;;  %v3109_v44 = vld [vmem:[#allocation8 + $0x174] sm:$0xf] }
 0x133   :  { %v3795_v11 = vpop.f32.mrf.mxu2  ;;  %v777_v18 = vpop.f32.mrf.mxu0  ;;  %v1464_v13 = vmul.f32 0.5, %v1400_v3 }
 0x134   :  { %v3797_v32 = vpop.f32.mrf.mxu3  ;;  %v1152_v58 = vmul.f32 0.044715, %v1088_v9  ;;  %v778_v19 = vadd.f32 %v777_v18, %v3789_v59  ;;  %v826_v10 = vpop.f32.mrf.mxu1  ;;  %v2922_v9 = vor.u32 %v3112_v8, %v2921_v4  ;;  %v1253_v18 = vmul.f32 0.7978846, %v1189_v45 }
 0x135   :  { %v1528_v26 = vmul.f32 %v1464_v13, %v3748_v5  ;;  %v1193_v13 = vadd.f32 %v1129_v57, %v3781_v34 }
 0x136   :  { %v1216_v25 = vadd.f32 %v1152_v58, %v3784_v14  ;;  %v3804_v28 = vadd.f32 %v826_v10, %v778_v19  ;;  %1970 = vmatmul.bf16.vlgmr.msra.gmra.mxu0 %v3585_v63  ;;  %2116 = vmatpush.bf16.msra.mxu3 %v2922_v9 }
 0x137   :  { %2019 = vmatmul.bf16.vlgmr.msra.gmra.mxu1 %v3603_v37  ;;  %v3810_v5 = vpack.c.bf16 %v1528_v26, %v1524_v35  ;;  %v1009_v26 = vmul.f32 %v3820_v33, %v3820_v33  ;;  %v1257_v38 = vmul.f32 0.7978846, %v1193_v13 }
 0x138   :  { %v1280_v24 = vmul.f32 0.7978846, %v1216_v25  ;;  %v966_v56 = vmul.f32 %v3804_v28, %v3804_v28  ;;  %v3181_v42 = vpop.eup %3180 }
 0x139   :  { %v1404_v2 = vadd.f32 1.0, %v3181_v42  ;;  %v1073_v45 = vmul.f32 %v1009_v26, %v3820_v33  ;;  %v712_v26 = vadd.f32 %v3753_v17, %v3523_v0 }
 0x13a   :  { %v1030_v55 = vmul.f32 %v966_v56, %v3804_v28  ;;  %3182 = vtanh.f32 %v1280_v24 }
 0x13b   :  { %v875_v51 = vpop.f32.mrf.mxu2  ;;  %v779_v62 = vpop.f32.mrf.mxu0  ;;  %v1468_v30 = vmul.f32 0.5, %v1404_v2  ;;  %3184 = vtanh.f32 %v1253_v18  ;;  %v1133_v18 = vmul.f32 0.044715, %v1069_v53 }
 0x13c   :  { %v876_v47 = vadd.f32 %v875_v51, %v3808_v40  ;;  %v924_v61 = vpop.f32.mrf.mxu3  ;;  %v1094_v15 = vmul.f32 0.044715, %v1030_v55  ;;  %v780_v1 = vadd.f32 %v779_v62, %v3789_v59  ;;  %v828_v3 = vpop.f32.mrf.mxu1 }
 0x13d   :  { %v1532_v62 = vmul.f32 %v1468_v30, %v3759_v23  ;;  %v2787_v30 = vld [vmem:[#allocation8 + $0x78] sm:$0xf0] }
 0x13e   :  { %v3823_v16 = vadd.f32 %v924_v61, %v876_v47  ;;  %v1158_v58 = vadd.f32 %v1094_v15, %v3804_v28  ;;  %v3827_v19 = vadd.f32 %v828_v3, %v780_v1 }
 0x140   :  { %v967_v10 = vmul.f32 %v3823_v16, %v3823_v16  ;;  %v3183_v35 = vpop.eup %3182  ;;  %v1222_v54 = vmul.f32 0.7978846, %v1158_v58  ;;  %v970_v22 = vmul.f32 %v3827_v19, %v3827_v19 }
 0x141   :  { %v1408_v29 = vadd.f32 1.0, %v3183_v35  ;;  %v3185_v2 = vpop.eup %3184 }
 0x142   :  { %v1031_v25 = vmul.f32 %v967_v10, %v3823_v16  ;;  %v1034_v6 = vmul.f32 %v970_v22, %v3827_v19  ;;  %3186 = vtanh.f32 %v1222_v54  ;;  %v2915_v10 = vld [vmem:[#allocation8 + $0x178] sm:$0xf0] }
 0x143   :  { %v877_v36 = vpop.f32.mrf.mxu2  ;;  %v782_v41 = vpop.f32.mrf.mxu0  ;;  %v1472_v42 = vmul.f32 0.5, %v1408_v29  ;;  %3188 = vtanh.f32 %v1257_v38  ;;  %v3077_v29 = vld [vmem:[#allocation8 + $0x74] sm:$0xf]  ;;  %v2979_v38 = vld [vmem:[#allocation8 + $0x1f8] sm:$0xf0] }
 0x144   :  { %v1095_v60 = vmul.f32 0.044715, %v1031_v25  ;;  %v878_v24 = vadd.f32 %v877_v36, %v3808_v40  ;;  %v926_v56 = vpop.f32.mrf.mxu3  ;;  %v1098_v57 = vmul.f32 0.044715, %v1034_v6  ;;  %v783_v55 = vadd.f32 %v782_v41, %v3789_v59  ;;  %v831_v51 = vpop.f32.mrf.mxu1  ;;  %v3125_v6 = vld [vmem:[#allocation8 + $0x1f4] sm:$0xf] }
 0x145   :  { %v1536_v15 = vmul.f32 %v1472_v42, %v3784_v14  ;;  %v1137_v14 = vmul.f32 0.044715, %v1073_v45  ;;  %v2918_v25 = vor.u32 %v3109_v44, %v2915_v10  ;;  %v1197_v41 = vadd.f32 %v1133_v18, %v3712_v39  ;;  %v2851_v44 = vld [vmem:[#allocation8 + $0xf8] sm:$0xf0] }
 0x146   :  { %v1159_v47 = vadd.f32 %v1095_v60, %v3823_v16  ;;  %v3844_v61 = vadd.f32 %v926_v56, %v878_v24  ;;  %v1162_v1 = vadd.f32 %v1098_v57, %v3827_v19  ;;  %v3849_v3 = vadd.f32 %v831_v51, %v783_v55  ;;  %1975 = vmatmul.bf16.gmra.mxu0 %v3629_v21 }
 0x147   :  { %2024 = vmatmul.bf16.gmra.mxu1 %v3650_v20  ;;  %v3855_v9 = vpack.c.bf16 %v1536_v15, %v1532_v62  ;;  %v2790_v56 = vor.u32 %v3077_v29, %v2787_v30  ;;  %2256 = vmatpush.bf16.msrb.mxu2 %v2918_v25  ;;  %v2982_v57 = vor.u32 %v3125_v6, %v2979_v38 }
 0x148   :  { %v1223_v4 = vmul.f32 0.7978846, %v1159_v47  ;;  %v971_v8 = vmul.f32 %v3844_v61, %v3844_v61  ;;  %v1226_v13 = vmul.f32 0.7978846, %v1162_v1  ;;  %v974_v23 = vmul.f32 %v3849_v3, %v3849_v3  ;;  %v3187_v35 = vpop.eup %3186 }
 0x149   :  { %v1350_v55 = vadd.f32 1.0, %v3187_v35  ;;  %2158 = vmatpush.bf16.msrb.mxu0 %v2790_v56  ;;  %v1201_v62 = vadd.f32 %v1137_v14, %v3820_v33  ;;  %2305 = vmatpush.bf16.msrb.mxu3 %v2982_v57  ;;  %v3874_v18 = vadd.f32 %v3755_v31, %v712_v26  ;;  %v1261_v35 = vmul.f32 0.7978846, %v1197_v41 }
 0x14a   :  { %v1035_v58 = vmul.f32 %v971_v8, %v3844_v61  ;;  %3190 = vtanh.f32 %v1226_v13  ;;  %v1038_v54 = vmul.f32 %v974_v23, %v3849_v3  ;;  %v3189_v8 = vpop.eup %3188  ;;  %v1013_v30 = vmul.f32 %v3745_v48, %v3745_v48 }
 0x14b   :  { %v880_v22 = vpop.f32.mrf.mxu2  ;;  %3192 = vtanh.f32 %v1223_v4  ;;  %v784_v24 = vpop.f32.mrf.mxu0  ;;  %v1381_v4 = vadd.f32 1.0, %v3185_v2  ;;  %v1414_v29 = vmul.f32 0.5, %v1350_v55  ;;  %v1265_v26 = vmul.f32 0.7978846, %v1201_v62 }
 0x14c   :  { %v1099_v36 = vmul.f32 0.044715, %v1035_v58  ;;  %v881_v53 = vadd.f32 %v880_v22, %v3808_v40  ;;  %v929_v60 = vpop.f32.mrf.mxu3  ;;  %v1102_v42 = vmul.f32 0.044715, %v1038_v54  ;;  %v785_v17 = vadd.f32 %v784_v24, %v3789_v59  ;;  %v833_v45 = vpop.f32.mrf.mxu1  ;;  %v3093_v58 = vld [vmem:[#allocation8 + $0xf4] sm:$0xf] }
 0x14d   :  { %v2854_v22 = vor.u32 %v3093_v58, %v2851_v44  ;;  %v1445_v58 = vmul.f32 0.5, %v1381_v4 }
 0x14e   :  { %v1163_v51 = vadd.f32 %v1099_v36, %v3844_v61  ;;  %v3867_v47 = vadd.f32 %v929_v60, %v881_v53  ;;  %v1166_v15 = vadd.f32 %v1102_v42, %v3849_v3  ;;  %v3871_v1 = vadd.f32 %v833_v45, %v785_v17 }
 0x14f   :  { %2207 = vmatpush.bf16.msrb.mxu1 %v2854_v22  ;;  %v1385_v53 = vadd.f32 1.0, %v3189_v8  ;;  %v1017_v60 = vmul.f32 %v3874_v18, %v3874_v18 }
 0x150   :  { %v1227_v13 = vmul.f32 0.7978846, %v1163_v51  ;;  %v975_v23 = vmul.f32 %v3867_v47, %v3867_v47  ;;  %v3191_v10 = vpop.eup %3190  ;;  %v1230_v54 = vmul.f32 0.7978846, %v1166_v15  ;;  %v978_v14 = vmul.f32 %v3871_v1, %v3871_v1 }
 0x151   :  { %v3193_v25 = vpop.eup %3192  ;;  %v1354_v2 = vadd.f32 1.0, %v3191_v10  ;;  %v1478_v51 = vmul.f32 %v1414_v29, %v3804_v28  ;;  %v1077_v29 = vmul.f32 %v1013_v30, %v3745_v48  ;;  %v1081_v4 = vmul.f32 %v1017_v60, %v3874_v18 }
 0x152   :  { %3194 = vtanh.f32 %v1227_v13  ;;  %v1039_v31 = vmul.f32 %v975_v23, %v3867_v47  ;;  %v1042_v6 = vmul.f32 %v978_v14, %v3871_v1  ;;  %v1351_v17 = vadd.f32 1.0, %v3193_v25 }
 0x153   :  { %v882_v36 = vpop.f32.mrf.mxu2  ;;  %v1418_v24 = vmul.f32 0.5, %v1354_v2  ;;  %v787_v42 = vpop.f32.mrf.mxu0  ;;  %3196 = vtanh.f32 %v1230_v54 }
 0x154   :  { %v1103_v56 = vmul.f32 0.044715, %v1039_v31  ;;  %v883_v38 = vadd.f32 %v882_v36, %v3808_v40  ;;  %v931_v41 = vpop.f32.mrf.mxu3  ;;  %v1106_v45 = vmul.f32 0.044715, %v1042_v6  ;;  %v788_v57 = vadd.f32 %v787_v42, %v3789_v59  ;;  %v836_v55 = vpop.f32.mrf.mxu1  ;;  %v3107_v31 = vld [vmem:[#allocation8 + $0x164] sm:$0xf] }
 0x155   :  { %v1482_v62 = vmul.f32 %v1418_v24, %v3827_v19  ;;  %3198 = vtanh.f32 %v1261_v35  ;;  %v1449_v19 = vmul.f32 0.5, %v1385_v53  ;;  %v1415_v14 = vmul.f32 0.5, %v1351_v17  ;;  %v2907_v6 = vld [vmem:[#allocation8 + $0x168] sm:$0xf0] }
 0x156   :  { %v1167_v15 = vadd.f32 %v1103_v56, %v3867_v47  ;;  %v3891_v8 = vadd.f32 %v931_v41, %v883_v38  ;;  %v1170_v13 = vadd.f32 %v1106_v45, %v3871_v1  ;;  %v3894_v23 = vadd.f32 %v836_v55, %v788_v57  ;;  %1980 = vmatmul.bf16.gmra.mxu0 %v3669_v50  ;;  %v3075_v41 = vld [vmem:[#allocation8 + $0x64] sm:$0xf]  ;;  %v2779_v42 = vld [vmem:[#allocation8 + $0x68] sm:$0xf0] }
 0x157   :  { %v3897_v10 = vpack.c.bf16 %v1482_v62, %v1478_v51  ;;  %2029 = vmatmul.bf16.gmra.mxu1 %v3688_v43  ;;  %3200 = vtanh.f32 %v1265_v26  ;;  %v2910_v38 = vor.u32 %v3107_v31, %v2907_v6  ;;  %v2782_v57 = vor.u32 %v3075_v41, %v2779_v42  ;;  %v3123_v55 = vld [vmem:[#allocation8 + $0x1e4] sm:$0xf] }
 0x158   :  { %v3195_v44 = vpop.eup %3194  ;;  %v1231_v54 = vmul.f32 0.7978846, %v1167_v15  ;;  %v979_v28 = vmul.f32 %v3891_v8, %v3891_v8  ;;  %v1234_v35 = vmul.f32 0.7978846, %v1170_v13  ;;  %v982_v25 = vmul.f32 %v3894_v23, %v3894_v23 }
 0x159   :  { %v1355_v22 = vadd.f32 1.0, %v3195_v44  ;;  %2068 = vmatmul.bf16.vlgmr.msra.gmra.mxu2 %v3897_v10  ;;  %v3197_v36 = vpop.eup %3196  ;;  %v1479_v26 = vmul.f32 %v1415_v14, %v3823_v16  ;;  %2159 = vmatpush.bf16.msrb.mxu0 %v2782_v57 }
 0x15a   :  { %v1043_v2 = vmul.f32 %v979_v28, %v3891_v8  ;;  %v1046_v53 = vmul.f32 %v982_v25, %v3894_v23  ;;  %3202 = vtanh.f32 %v1234_v35  ;;  %2257 = vmatpush.bf16.msrb.mxu2 %v2910_v38  ;;  %v2971_v28 = vld [vmem:[#allocation8 + $0x1e8] sm:$0xf0]  ;;  %v1358_v35 = vadd.f32 1.0, %v3197_v36 }
 0x15b   :  { %v1419_v24 = vmul.f32 0.5, %v1355_v22  ;;  %v885_v56 = vpop.f32.mrf.mxu2  ;;  %3204 = vtanh.f32 %v1231_v54  ;;  %v789_v45 = vpop.f32.mrf.mxu0  ;;  %v2974_v25 = vor.u32 %v3123_v55, %v2971_v28  ;;  %v3924_v38 = vmul.f32 %v1445_v58, %v3679_v12 }
 0x15c   :  { %v1107_v30 = vmul.f32 0.044715, %v1043_v2  ;;  %v886_v60 = vadd.f32 %v885_v56, %v3808_v40  ;;  %v934_v17 = vpop.f32.mrf.mxu3  ;;  %v3199_v51 = vpop.eup %3198  ;;  %v1110_v15 = vmul.f32 0.044715, %v1046_v53  ;;  %v790_v13 = vadd.f32 %v789_v45, %v3789_v59  ;;  %v3091_v53 = vld [vmem:[#allocation8 + $0xe4] sm:$0xf] }
 0x15d   :  { %v1483_v62 = vmul.f32 %v1419_v24, %v3844_v61  ;;  %v838_v44 = vpop.f32.mrf.mxu1  ;;  %v1145_v2 = vmul.f32 0.044715, %v1081_v4  ;;  %v3201_v61 = vpop.eup %3200  ;;  %2306 = vmatpush.bf16.msrb.mxu3 %v2974_v25  ;;  %v2843_v56 = vld [vmem:[#allocation8 + $0xe8] sm:$0xf0]  ;;  %v1422_v57 = vmul.f32 0.5, %v1358_v35 }
 0x15e   :  { %v1171_v54 = vadd.f32 %v1107_v30, %v3891_v8  ;;  %v3914_v22 = vadd.f32 %v934_v17, %v886_v60  ;;  %v1174_v16 = vadd.f32 %v1110_v15, %v3894_v23  ;;  %v3919_v14 = vadd.f32 %v838_v44, %v790_v13 }
 0x15f   :  { %v3916_v31 = vpack.c.bf16 %v1483_v62, %v1479_v26  ;;  %v2846_v42 = vor.u32 %v3091_v53, %v2843_v56  ;;  %v3930_v30 = vmul.f32 %v1449_v19, %v3781_v34  ;;  %v1141_v55 = vmul.f32 0.044715, %v1077_v29 }
 0x160   :  { %v1235_v6 = vmul.f32 0.7978846, %v1171_v54  ;;  %v983_v24 = vmul.f32 %v3914_v22, %v3914_v22  ;;  %v3203_v36 = vpop.eup %3202  ;;  %v1238_v41 = vmul.f32 0.7978846, %v1174_v16  ;;  %v986_v4 = vmul.f32 %v3919_v14, %v3919_v14 }
 0x161   :  { %2117 = vmatmul.bf16.vlgmr.msra.gmra.mxu3 %v3916_v31  ;;  %v3205_v60 = vpop.eup %3204  ;;  %v1362_v45 = vadd.f32 1.0, %v3203_v36  ;;  %v1209_v12 = vadd.f32 %v1145_v2, %v3874_v18  ;;  %2208 = vmatpush.bf16.msrb.mxu1 %v2846_v42  ;;  %v1389_v62 = vadd.f32 1.0, %v3199_v51  ;;  %v717_v15 = vadd.f32 %v3795_v11, %v3523_v0 }
 0x162   :  { %v1047_v17 = vmul.f32 %v983_v24, %v3914_v22  ;;  %3206 = vtanh.f32 %v1235_v6  ;;  %v1050_v58 = vmul.f32 %v986_v4, %v3919_v14  ;;  %v1359_v25 = vadd.f32 1.0, %v3205_v60 }
 0x163   :  { %v887_v26 = vpop.f32.mrf.mxu2  ;;  %v792_v44 = vpop.f32.mrf.mxu0  ;;  %v1426_v28 = vmul.f32 0.5, %v1362_v45  ;;  %3208 = vtanh.f32 %v1238_v41  ;;  %v1486_v51 = vmul.f32 %v1422_v57, %v3849_v3  ;;  %v1205_v11 = vadd.f32 %v1141_v55, %v3745_v48 }
 0x164   :  { %v1111_v13 = vmul.f32 0.044715, %v1047_v17  ;;  %v888_v34 = vadd.f32 %v887_v26, %v3808_v40  ;;  %v936_v19 = vpop.f32.mrf.mxu3  ;;  %v1114_v54 = vmul.f32 0.044715, %v1050_v58  ;;  %v793_v29 = vadd.f32 %v792_v44, %v3789_v59  ;;  %v3105_v26 = vld [vmem:[#allocation8 + $0x154] sm:$0xf] }
 0x165   :  { %v841_v35 = vpop.f32.mrf.mxu1  ;;  %v1490_v0 = vmul.f32 %v1426_v28, %v3871_v1  ;;  %v3949_v53 = vmul.f32 0.5, %v1389_v62  ;;  %v3956_v1 = vadd.f32 1.0, %v3201_v61  ;;  %v1423_v17 = vmul.f32 0.5, %v1359_v25  ;;  %v2899_v61 = vld [vmem:[#allocation8 + $0x158] sm:$0xf0] }
 0x166   :  { %v1175_v2 = vadd.f32 %v1111_v13, %v3914_v22  ;;  %v3940_v16 = vadd.f32 %v936_v19, %v888_v34  ;;  %v1178_v6 = vadd.f32 %v1114_v54, %v3919_v14  ;;  %v3946_v24 = vadd.f32 %v841_v35, %v793_v29  ;;  %1985 = vmatmul.bf16.gmra.mxu0 %v3704_v49  ;;  %v2771_v28 = vld [vmem:[#allocation8 + $0x58] sm:$0xf0]  ;;  %v3121_v25 = vld [vmem:[#allocation8 + $0x1d4] sm:$0xf] }
 0x167   :  { %2034 = vmatmul.bf16.gmra.mxu1 %v3721_v7  ;;  %v3954_v3 = vpack.c.bf16 %v1490_v0, %v1486_v51  ;;  %v1273_v45 = vmul.f32 0.7978846, %v1209_v12  ;;  %v1021_v57 = vmul.f32 %v3776_v46, %v3776_v46  ;;  %v3963_v55 = vadd.f32 %v3797_v32, %v717_v15  ;;  %v3073_v12 = vld [vmem:[#allocation8 + $0x54] sm:$0xf] }
 0x168   :  { %v3207_v56 = vpop.eup %3206  ;;  %v1239_v36 = vmul.f32 0.7978846, %v1175_v2  ;;  %v987_v41 = vmul.f32 %v3940_v16, %v3940_v16  ;;  %v1242_v4 = vmul.f32 0.7978846, %v1178_v6  ;;  %v990_v42 = vmul.f32 %v3946_v24, %v3946_v24 }
 0x169   :  { %v1363_v60 = vadd.f32 1.0, %v3207_v56  ;;  %2073 = vmatmul.bf16.gmra.mxu2 %v3954_v3  ;;  %v3209_v62 = vpop.eup %3208  ;;  %v2902_v44 = vor.u32 %v3105_v26, %v2899_v61  ;;  %v2774_v35 = vor.u32 %v3073_v12, %v2771_v28  ;;  %v1487_v6 = vmul.f32 %v1423_v17, %v3867_v47 }
 0x16a   :  { %v1051_v58 = vmul.f32 %v987_v41, %v3940_v16  ;;  %v1054_v13 = vmul.f32 %v990_v42, %v3946_v24  ;;  %3210 = vtanh.f32 %v1242_v4  ;;  %v2963_v41 = vld [vmem:[#allocation8 + $0x1d8] sm:$0xf0]  ;;  %v1366_v42 = vadd.f32 1.0, %v3209_v62 }
 0x16b   :  { %v890_v34 = vpop.f32.mrf.mxu2  ;;  %v1427_v19 = vmul.f32 0.5, %v1363_v60  ;;  %3212 = vtanh.f32 %v1239_v36  ;;  %v794_v29 = vpop.f32.mrf.mxu0  ;;  %2258 = vmatpush.bf16.msrb.mxu2 %v2902_v44  ;;  %2160 = vmatpush.bf16.msrb.mxu0 %v2774_v35  ;;  %v2966_v60 = vor.u32 %v3121_v25, %v2963_v41  ;;  %v1025_v47 = vmul.f32 %v3963_v55, %v3963_v55 }
 0x16c   :  { %v1115_v54 = vmul.f32 0.044715, %v1051_v58  ;;  %v891_v32 = vadd.f32 %v890_v34, %v3808_v40  ;;  %v939_v15 = vpop.f32.mrf.mxu3  ;;  %v1118_v2 = vmul.f32 0.044715, %v1054_v13  ;;  %v795_v51 = vadd.f32 %v794_v29, %v3789_v59  ;;  %v3089_v34 = vld [vmem:[#allocation8 + $0xd4] sm:$0xf] }
 0x16d   :  { %v843_v0 = vpop.f32.mrf.mxu1  ;;  %v1491_v56 = vmul.f32 %v1427_v19, %v3891_v8  ;;  %v1085_v58 = vmul.f32 %v1021_v57, %v3776_v46  ;;  %v3987_v62 = vpack.c.bf16 %v3930_v30, %v3924_v38  ;;  %2307 = vmatpush.bf16.msrb.mxu3 %v2966_v60  ;;  %v2835_v57 = vld [vmem:[#allocation8 + $0xd8] sm:$0xf0]  ;;  %v1269_v44 = vmul.f32 0.7978846, %v1205_v11 }
 0x16e   :  { %v1179_v4 = vadd.f32 %v1115_v54, %v3940_v16  ;;  %v3973_v36 = vadd.f32 %v939_v15, %v891_v32  ;;  %v1182_v26 = vadd.f32 %v1118_v2, %v3946_v24  ;;  %v3977_v61 = vadd.f32 %v843_v0, %v795_v51 }
 0x16f   :  { %v3979_v13 = vpack.c.bf16 %v1491_v56, %v1487_v6  ;;  %v2838_v54 = vor.u32 %v3089_v34, %v2835_v57  ;;  %v1430_v35 = vmul.f32 0.5, %v1366_v42  ;;  %v1149_v38 = vmul.f32 0.044715, %v1085_v58 }
 0x170   :  { %v1243_v8 = vmul.f32 0.7978846, %v1179_v4  ;;  %v991_v17 = vmul.f32 %v3973_v36, %v3973_v36  ;;  %v3211_v19 = vpop.eup %3210  ;;  %v1246_v12 = vmul.f32 0.7978846, %v1182_v26  ;;  %v994_v28 = vmul.f32 %v3977_v61, %v3977_v61 }
 0x171   :  { %2122 = vmatmul.bf16.gmra.mxu3 %v3979_v13  ;;  %v3213_v32 = vpop.eup %3212  ;;  %v1370_v29 = vadd.f32 1.0, %v3211_v19  ;;  %2209 = vmatpush.bf16.msrb.mxu1 %v2838_v54  ;;  %v1457_v11 = vmul.f32 0.5, %v3956_v1  ;;  %v1089_v2 = vmul.f32 %v1025_v47, %v3963_v55  ;;  %v1494_v1 = vmul.f32 %v1430_v35, %v3894_v23  ;;  %v3103_v35 = vld [vmem:[#allocation8 + $0x144] sm:$0xf] }
 0x172   :  { %v1055_v15 = vmul.f32 %v991_v17, %v3973_v36  ;;  %3214 = vtanh.f32 %v1243_v8  ;;  %v1058_v30 = vmul.f32 %v994_v28, %v3977_v61  ;;  %v1367_v58 = vadd.f32 1.0, %v3213_v32 }
 0x173   :  { %v892_v25 = vpop.f32.mrf.mxu2  ;;  %3216 = vtanh.f32 %v1273_v45  ;;  %v797_v56 = vpop.f32.mrf.mxu0  ;;  %v1434_v41 = vmul.f32 0.5, %v1370_v29  ;;  %v1517_v34 = vmul.f32 %v3949_v53, %v3712_v39  ;;  %v1213_v29 = vadd.f32 %v1149_v38, %v3776_v46 }
 0x174   :  { %v1119_v51 = vmul.f32 0.044715, %v1055_v15  ;;  %v893_v0 = vadd.f32 %v892_v25, %v3808_v40  ;;  %v941_v6 = vpop.f32.mrf.mxu3  ;;  %3218 = vtanh.f32 %v1246_v12  ;;  %v1122_v4 = vmul.f32 0.044715, %v1058_v30  ;;  %v2891_v30 = vld [vmem:[#allocation8 + $0x148] sm:$0xf0] }
 0x175   :  { %v798_v42 = vadd.f32 %v797_v56, %v3789_v59  ;;  %v846_v60 = vpop.f32.mrf.mxu1  ;;  %v1498_v45 = vmul.f32 %v1434_v41, %v3919_v14  ;;  %3220 = vtanh.f32 %v1269_v44  ;;  %v1431_v15 = vmul.f32 0.5, %v1367_v58  ;;  %v3071_v41 = vld [vmem:[#allocation8 + $0x44] sm:$0xf] }
 0x176   :  { %v1183_v26 = vadd.f32 %v1119_v51, %v3973_v36  ;;  %v3999_v8 = vadd.f32 %v941_v6, %v893_v0  ;;  %v1186_v47 = vadd.f32 %v1122_v4, %v3977_v61  ;;  %1990 = vmatmul.bf16.gmra.mxu0 %v3737_v52  ;;  %v1153_v39 = vmul.f32 0.044715, %v1089_v2  ;;  %v2763_v4 = vld [vmem:[#allocation8 + $0x48] sm:$0xf0] }
 0x177   :  { %v4004_v17 = vadd.f32 %v846_v60, %v798_v42  ;;  %2039 = vmatmul.bf16.gmra.mxu1 %v3987_v62  ;;  %v4012_v23 = vpack.c.bf16 %v1498_v45, %v1494_v1  ;;  %v1521_v44 = vmul.f32 %v1457_v11, %v3820_v33  ;;  %v2894_v56 = vor.u32 %v3103_v35, %v2891_v30 }
 0x178   :  { %v3215_v57 = vpop.eup %3214  ;;  %v1247_v19 = vmul.f32 0.7978846, %v1183_v26  ;;  %v995_v12 = vmul.f32 %v3999_v8, %v3999_v8  ;;  %v1250_v28 = vmul.f32 0.7978846, %v1186_v47  ;;  %v2766_v58 = vor.u32 %v3071_v41, %v2763_v4  ;;  %v3119_v26 = vld [vmem:[#allocation8 + $0x1c4] sm:$0xf] }
 0x179   :  { %v3217_v14 = vpop.eup %3216  ;;  %v998_v54 = vmul.f32 %v4004_v17, %v4004_v17  ;;  %v1371_v32 = vadd.f32 1.0, %v3215_v57  ;;  %2078 = vmatmul.bf16.gmra.mxu2 %v4012_v23  ;;  %v1495_v45 = vmul.f32 %v1431_v15, %v3914_v22  ;;  %v2955_v57 = vld [vmem:[#allocation8 + $0x1c8] sm:$0xf0]  ;;  %v4035_v15 = vpack.c.bf16 %v1521_v44, %v1517_v34 }
 0x17a   :  { %v1059_v53 = vmul.f32 %v995_v12, %v3999_v8  ;;  %v3219_v25 = vpop.eup %3218  ;;  %3222 = vtanh.f32 %v1250_v28  ;;  %2259 = vmatpush.bf16.msrb.mxu2 %v2894_v56  ;;  %2161 = vmatpush.bf16.msrb.mxu0 %v2766_v58  ;;  %v1277_v34 = vmul.f32 0.7978846, %v1213_v29 }
 0x17b   :  { %v1062_v51 = vmul.f32 %v998_v54, %v4004_v17  ;;  %v895_v0 = vpop.f32.mrf.mxu2  ;;  %v1435_v6 = vmul.f32 0.5, %v1371_v32  ;;  %3224 = vtanh.f32 %v1247_v19  ;;  %v799_v60 = vpop.f32.mrf.mxu0  ;;  %v1374_v54 = vadd.f32 1.0, %v3219_v25 }
 0x17c   :  { %v1123_v38 = vmul.f32 0.044715, %v1059_v53  ;;  %v896_v2 = vadd.f32 %v895_v0, %v3808_v40  ;;  %v944_v42 = vpop.f32.mrf.mxu3  ;;  %v800_v11 = vadd.f32 %v799_v60, %v3789_v59  ;;  %v3221_v12 = vpop.eup %3220  ;;  %v2958_v32 = vor.u32 %v3119_v26, %v2955_v57  ;;  %v3087_v0 = vld [vmem:[#allocation8 + $0xc4] sm:$0xf] }
 0x17d   :  { %v1126_v33 = vmul.f32 0.044715, %v1062_v51  ;;  %v848_v1 = vpop.f32.mrf.mxu1  ;;  %v1499_v47 = vmul.f32 %v1435_v6, %v3940_v16  ;;  %v1401_v51 = vadd.f32 1.0, %v3217_v14  ;;  %v2827_v6 = vld [vmem:[#allocation8 + $0xc8] sm:$0xf0]  ;;  %v1217_v25 = vadd.f32 %v1153_v39, %v3963_v55 }
 0x17e   :  { %v1187_v19 = vadd.f32 %v1123_v38, %v3999_v8  ;;  %v4026_v28 = vadd.f32 %v944_v42, %v896_v2  ;;  %v4029_v35 = vadd.f32 %v848_v1, %v800_v11  ;;  %2308 = vmatpush.bf16.msrb.mxu3 %v2958_v32  ;;  %v2830_v38 = vor.u32 %v3087_v0, %v2827_v6 }
 0x17f   :  { %v1190_v53 = vadd.f32 %v1126_v33, %v4004_v17  ;;  %v4031_v30 = vpack.c.bf16 %v1499_v47, %v1495_v45  ;;  %v1438_v60 = vmul.f32 0.5, %v1374_v54  ;;  %v1397_v39 = vadd.f32 1.0, %v3221_v12 }
 0x180   :  { %v1251_v22 = vmul.f32 0.7978846, %v1187_v19  ;;  %v999_v16 = vmul.f32 %v4026_v28, %v4026_v28  ;;  %v3223_v56 = vpop.eup %3222  ;;  %v1002_v4 = vmul.f32 %v4029_v35, %v4029_v35  ;;  %2210 = vmatpush.bf16.msrb.mxu1 %v2830_v38  ;;  %v1465_v47 = vmul.f32 0.5, %v1401_v51 }
 0x181   :  { %v1254_v41 = vmul.f32 0.7978846, %v1190_v53  ;;  %2127 = vmatmul.bf16.gmra.mxu3 %v4031_v30  ;;  %v3225_v14 = vpop.eup %3224  ;;  %v1378_v42 = vadd.f32 1.0, %v3223_v56  ;;  %v1281_v57 = vmul.f32 0.7978846, %v1217_v25  ;;  %v1461_v51 = vmul.f32 0.5, %v1397_v39 }
 0x182   :  { %v1063_v2 = vmul.f32 %v999_v16, %v4026_v28  ;;  %3226 = vtanh.f32 %v1251_v22  ;;  %v1066_v44 = vmul.f32 %v1002_v4, %v4029_v35  ;;  %v1375_v53 = vadd.f32 1.0, %v3225_v14 }
 0x183   :  { %3228 = vtanh.f32 %v1254_v41  ;;  %v897_v58 = vpop.f32.mrf.mxu2  ;;  %v802_v1 = vpop.f32.mrf.mxu0  ;;  %v1442_v45 = vmul.f32 0.5, %v1378_v42  ;;  %v1502_v16 = vmul.f32 %v1438_v60, %v3946_v24  ;;  %v1529_v60 = vmul.f32 %v1465_v47, %v3874_v18  ;;  %v3117_v18 = vld [vmem:[#allocation8 + $0x1b4] sm:$0xf] }
 0x184   :  { %v1127_v26 = vmul.f32 0.044715, %v1063_v2  ;;  %v898_v33 = vadd.f32 %v897_v58, %v3808_v40  ;;  %v946_v11 = vpop.f32.mrf.mxu3  ;;  %v1130_v19 = vmul.f32 0.044715, %v1066_v44  ;;  %v803_v32 = vadd.f32 %v802_v1, %v3789_v59  ;;  %v3101_v44 = vld [vmem:[#allocation8 + $0x134] sm:$0xf] }
 0x185   :  { %v851_v54 = vpop.f32.mrf.mxu1  ;;  %v1506_v12 = vmul.f32 %v1442_v45, %v3977_v61  ;;  %3230 = vtanh.f32 %v1277_v34  ;;  %v1439_v2 = vmul.f32 0.5, %v1375_v53  ;;  %v2883_v58 = vld [vmem:[#allocation8 + $0x138] sm:$0xf0]  ;;  %v3069_v1 = vld [vmem:[#allocation8 + $0x34] sm:$0xf] }
 0x186   :  { %v1191_v29 = vadd.f32 %v1127_v26, %v4026_v28  ;;  %v4046_v22 = vadd.f32 %v946_v11, %v898_v33  ;;  %v1194_v0 = vadd.f32 %v1130_v19, %v4029_v35  ;;  %v4051_v6 = vadd.f32 %v851_v54, %v803_v32  ;;  %1995 = vmatmul.bf16.gmra.mxu0 %v3769_v27  ;;  %v2755_v45 = vld [vmem:[#allocation8 + $0x38] sm:$0xf0] }
 0x187   :  { %2044 = vmatmul.bf16.gmra.mxu1 %v4035_v15  ;;  %v4057_v4 = vpack.c.bf16 %v1506_v12, %v1502_v16  ;;  %3232 = vtanh.f32 %v1281_v57  ;;  %v2886_v11 = vor.u32 %v3101_v44, %v2883_v58  ;;  %v1503_v12 = vmul.f32 %v1439_v2, %v3973_v36  ;;  %v2747_v2 = vld [vmem:[#allocation8 + $0x28] sm:$0xf0] }
 0x188   :  { %v3227_v56 = vpop.eup %3226  ;;  %v1255_v25 = vmul.f32 0.7978846, %v1191_v29  ;;  %v1003_v41 = vmul.f32 %v4046_v22, %v4046_v22  ;;  %v1258_v38 = vmul.f32 0.7978846, %v1194_v0  ;;  %v1006_v61 = vmul.f32 %v4051_v6, %v4051_v6 }
 0x189   :  { %v3229_v24 = vpop.eup %3228  ;;  %v1379_v14 = vadd.f32 1.0, %v3227_v56  ;;  %2083 = vmatmul.bf16.gmra.mxu2 %v4057_v4  ;;  %v2758_v29 = vor.u32 %v3069_v1, %v2755_v45  ;;  %v2947_v56 = vld [vmem:[#allocation8 + $0x1b8] sm:$0xf0] }
 0x18a   :  { %v1067_v42 = vmul.f32 %v1003_v41, %v4046_v22  ;;  %v1382_v34 = vadd.f32 1.0, %v3229_v24  ;;  %v1070_v39 = vmul.f32 %v1006_v61, %v4051_v6  ;;  %3234 = vtanh.f32 %v1258_v38  ;;  %2260 = vmatpush.bf16.msrb.mxu2 %v2886_v11  ;;  %v3085_v41 = vld [vmem:[#allocation8 + $0xb4] sm:$0xf] }
 0x18b   :  { %v900_v26 = vpop.f32.mrf.mxu2  ;;  %v1443_v33 = vmul.f32 0.5, %v1379_v14  ;;  %3236 = vtanh.f32 %v1255_v25  ;;  %v804_v53 = vpop.f32.mrf.mxu0  ;;  %2162 = vmatpush.bf16.msrb.mxu0 %v2758_v29  ;;  %v2950_v14 = vor.u32 %v3117_v18, %v2947_v56 }
 0x18c   :  { %v1131_v19 = vmul.f32 0.044715, %v1067_v42  ;;  %v901_v32 = vadd.f32 %v900_v26, %v3808_v40  ;;  %v949_v54 = vpop.f32.mrf.mxu3  ;;  %v1134_v47 = vmul.f32 0.044715, %v1070_v39  ;;  %v805_v16 = vadd.f32 %v804_v53, %v3789_v59  ;;  %v3231_v24 = vpop.eup %3230  ;;  %v2819_v42 = vld [vmem:[#allocation8 + $0xb8] sm:$0xf0] }
 0x18d   :  { %v853_v57 = vpop.f32.mrf.mxu1  ;;  %v1507_v0 = vmul.f32 %v1443_v33, %v3999_v8  ;;  %v1446_v61 = vmul.f32 0.5, %v1382_v34  ;;  %v2822_v36 = vor.u32 %v3085_v41, %v2819_v42  ;;  %v3067_v8 = vld [vmem:[#allocation8 + $0x24] sm:$0xf]  ;;  %v3233_v33 = vpop.eup %3232  ;;  %v1525_v34 = vmul.f32 %v1461_v51, %v3745_v48  ;;  %2309 = vmatpush.bf16.msrb.mxu3 %v2950_v14  ;;  %v3065_v41 = vld [vmem:[#allocation8 + $0x14] sm:$0xf] }
 0x18e   :  { %v1195_v25 = vadd.f32 %v1131_v19, %v4046_v22  ;;  %v4070_v38 = vadd.f32 %v949_v54, %v901_v32  ;;  %v1198_v44 = vadd.f32 %v1134_v47, %v4051_v6  ;;  %v4073_v58 = vadd.f32 %v853_v57, %v805_v16  ;;  %v3083_v26 = vld [vmem:[#allocation8 + $0xa4] sm:$0xf]  ;;  %v2811_v19 = vld [vmem:[#allocation8 + $0xa8] sm:$0xf0] }
 0x18f   :  { %v4075_v39 = vpack.c.bf16 %v1507_v0, %v1503_v12  ;;  %v2750_v45 = vor.u32 %v3067_v8, %v2747_v2  ;;  %2211 = vmatpush.bf16.msrb.mxu1 %v2822_v36  ;;  %v2814_v29 = vor.u32 %v3083_v26, %v2811_v19  ;;  %v4084_v16 = vpack.c.bf16 %v1529_v60, %v1525_v34  ;;  %v3081_v2 = vld [vmem:[#allocation8 + $0x94] sm:$0xf] }
 0x190   :  { %v1259_v11 = vmul.f32 0.7978846, %v1195_v25  ;;  %v1007_v1 = vmul.f32 %v4070_v38, %v4070_v38  ;;  %v3235_v32 = vpop.eup %3234  ;;  %v1262_v54 = vmul.f32 0.7978846, %v1198_v44  ;;  %v1010_v53 = vmul.f32 %v4073_v58, %v4073_v58  ;;  %v2739_v25 = vld [vmem:[#allocation8 + $0x18] sm:$0xf0] }
 0x191   :  { %2132 = vmatmul.bf16.gmra.mxu3 %v4075_v39  ;;  %v3237_v18 = vpop.eup %3236  ;;  %v1386_v57 = vadd.f32 1.0, %v3235_v32  ;;  %2163 = vmatpush.bf16.msrb.mxu0 %v2750_v45  ;;  %v1510_v12 = vmul.f32 %v1446_v61, %v4004_v17  ;;  %v1405_v0 = vadd.f32 1.0, %v3231_v24  ;;  %v1409_v56 = vadd.f32 1.0, %v3233_v33  ;;  %v2803_v17 = vld [vmem:[#allocation8 + $0x98] sm:$0xf0] }
 0x192   :  { %v1071_v47 = vmul.f32 %v1007_v1, %v4070_v38  ;;  %3238 = vtanh.f32 %v1259_v11  ;;  %v1074_v48 = vmul.f32 %v1010_v53, %v4073_v58  ;;  %v2742_v60 = vor.u32 %v3065_v41, %v2739_v25  ;;  %v2731_v53 = vld [vmem:[#allocation8 + $0x8] sm:$0xf0] }
 0x193   :  { %v902_v51 = vpop.f32.mrf.mxu2  ;;  %v807_v36 = vpop.f32.mrf.mxu0  ;;  %v1450_v8 = vmul.f32 0.5, %v1386_v57  ;;  %3240 = vtanh.f32 %v1262_v54  ;;  %v1383_v34 = vadd.f32 1.0, %v3237_v18  ;;  %2212 = vmatpush.bf16.msrb.mxu1 %v2814_v29  ;;  %v2806_v45 = vor.u32 %v3081_v2, %v2803_v17  ;;  %v3063_v54 = vld [vmem:[#allocation8 + $0x4] sm:$0xf]  ;;  %v2875_v2 = vld [vmem:[#allocation8 + $0x128] sm:$0xf0] }
 0x194   :  { %v1135_v14 = vmul.f32 0.044715, %v1071_v47  ;;  %v903_v42 = vadd.f32 %v902_v51, %v3808_v40  ;;  %v951_v44 = vpop.f32.mrf.mxu3  ;;  %v1138_v26 = vmul.f32 0.044715, %v1074_v48  ;;  %v808_v11 = vadd.f32 %v807_v36, %v3789_v59  ;;  %v3079_v47 = vld [vmem:[#allocation8 + $0x84] sm:$0xf] }
 0x195   :  { %v856_v1 = vpop.f32.mrf.mxu1  ;;  %v1514_v33 = vmul.f32 %v1450_v8, %v4029_v35  ;;  %2164 = vmatpush.bf16.msrb.mxu0 %v2742_v60  ;;  %v2734_v35 = vor.u32 %v3063_v54, %v2731_v53  ;;  %v2795_v51 = vld [vmem:[#allocation8 + $0x88] sm:$0xf0]  ;;  %v1469_v36 = vmul.f32 0.5, %v1405_v0  ;;  %v1473_v8 = vmul.f32 0.5, %v1409_v56  ;;  %v3099_v60 = vld [vmem:[#allocation8 + $0x124] sm:$0xf] }
 0x196   :  { %v1199_v24 = vadd.f32 %v1135_v14, %v4070_v38  ;;  %v4091_v61 = vadd.f32 %v951_v44, %v903_v42  ;;  %v1202_v19 = vadd.f32 %v1138_v26, %v4073_v58  ;;  %v4095_v32 = vadd.f32 %v856_v1, %v808_v11  ;;  %2000 = vmatmul.bf16.gmra.mxu0 %v3810_v5 }
 0x197   :  { %2049 = vmatmul.bf16.gmra.mxu1 %v4084_v16  ;;  %v4101_v48 = vpack.c.bf16 %v1514_v33, %v1510_v12  ;;  %v1447_v42 = vmul.f32 0.5, %v1383_v34  ;;  %v2798_v12 = vor.u32 %v3079_v47, %v2795_v51  ;;  %v3115_v33 = vld [vmem:[#allocation8 + $0x1a4] sm:$0xf]  ;;  %v2939_v34 = vld [vmem:[#allocation8 + $0x1a8] sm:$0xf0] }
 0x198   :  { %v3239_v18 = vpop.eup %3238  ;;  %v1263_v29 = vmul.f32 0.7978846, %v1199_v24  ;;  %v1011_v57 = vmul.f32 %v4091_v61, %v4091_v61  ;;  %v1266_v41 = vmul.f32 0.7978846, %v1202_v19  ;;  %v1014_v25 = vmul.f32 %v4095_v32, %v4095_v32  ;;  %2213 = vmatpush.bf16.msrb.mxu1 %v2806_v45 }
 0x199   :  { %v1387_v14 = vadd.f32 1.0, %v3239_v18  ;;  %2088 = vmatmul.bf16.gmra.mxu2 %v4101_v48  ;;  %2165 = vmatpush.bf16.msrb.mxu0 %v2734_v35  ;;  %v3241_v26 = vpop.eup %3240  ;;  %v2878_v24 = vor.u32 %v3099_v60, %v2875_v2  ;;  %v2942_v56 = vor.u32 %v3115_v33, %v2939_v34  ;;  %v2867_v2 = vld [vmem:[#allocation8 + $0x118] sm:$0xf0] }
 0x19a   :  { %v1075_v44 = vmul.f32 %v1011_v57, %v4091_v61  ;;  %v1078_v11 = vmul.f32 %v1014_v25, %v4095_v32  ;;  %3242 = vtanh.f32 %v1266_v41  ;;  %v1511_v57 = vmul.f32 %v1447_v42, %v4026_v28  ;;  %v3097_v42 = vld [vmem:[#allocation8 + $0x114] sm:$0xf] }
 0x19b   :  { %v905_v1 = vpop.f32.mrf.mxu2  ;;  %v1451_v17 = vmul.f32 0.5, %v1387_v14  ;;  %3244 = vtanh.f32 %v1263_v29  ;;  %v809_v0 = vpop.f32.mrf.mxu0  ;;  %2261 = vmatpush.bf16.msrb.mxu2 %v2878_v24  ;;  %v1390_v29 = vadd.f32 1.0, %v3241_v26  ;;  %2310 = vmatpush.bf16.msrb.mxu3 %v2942_v56  ;;  %v3113_v24 = vld [vmem:[#allocation8 + $0x194] sm:$0xf] }
 0x19c   :  { %v1139_v45 = vmul.f32 0.044715, %v1075_v44  ;;  %v906_v19 = vadd.f32 %v905_v1, %v3808_v40  ;;  %v954_v54 = vpop.f32.mrf.mxu3  ;;  %v1142_v53 = vmul.f32 0.044715, %v1078_v11  ;;  %v810_v18 = vadd.f32 %v809_v0, %v3789_v59  ;;  %2214 = vmatpush.bf16.msrb.mxu1 %v2798_v12 }
 0x19d   :  { %v858_v47 = vpop.f32.mrf.mxu1  ;;  %v1515_v35 = vmul.f32 %v1451_v17, %v4046_v22  ;;  %v1537_v22 = vmul.f32 %v1473_v8, %v3963_v55  ;;  %v1533_v1 = vmul.f32 %v1469_v36, %v3776_v46  ;;  %v2870_v17 = vor.u32 %v3097_v42, %v2867_v2  ;;  %v2931_v55 = vld [vmem:[#allocation8 + $0x198] sm:$0xf0] }
 0x19e   :  { %v1203_v51 = vadd.f32 %v1139_v45, %v4091_v61  ;;  %v4113_v41 = vadd.f32 %v954_v54, %v906_v19  ;;  %v1206_v25 = vadd.f32 %v1142_v53, %v4095_v32  ;;  %v4116_v14 = vadd.f32 %v858_v47, %v810_v18 }
 0x19f   :  { %v4118_v44 = vpack.c.bf16 %v1515_v35, %v1511_v57  ;;  %v1454_v19 = vmul.f32 0.5, %v1390_v29  ;;  %2262 = vmatpush.bf16.msrb.mxu2 %v2870_v17  ;;  %v2934_v0 = vor.u32 %v3113_v24, %v2931_v55  ;;  %v4130_v46 = vpack.c.bf16 %v1537_v22, %v1533_v1 }
 0x1a0   :  { %v1267_v60 = vmul.f32 0.7978846, %v1203_v51  ;;  %v1015_v28 = vmul.f32 %v4113_v41, %v4113_v41  ;;  %v3243_v12 = vpop.eup %3242  ;;  %v1270_v11 = vmul.f32 0.7978846, %v1206_v25  ;;  %v1018_v26 = vmul.f32 %v4116_v14, %v4116_v14 }
 0x1a1   :  { %2137 = vmatmul.bf16.gmra.mxu3 %v4118_v44  ;;  %v3245_v33 = vpop.eup %3244  ;;  %v1394_v45 = vadd.f32 1.0, %v3243_v12 }
 0x1a2   :  { %v1079_v34 = vmul.f32 %v1015_v28, %v4113_v41  ;;  %3246 = vtanh.f32 %v1267_v60  ;;  %v1082_v8 = vmul.f32 %v1018_v26, %v4116_v14  ;;  %v1391_v29 = vadd.f32 1.0, %v3245_v33  ;;  %2311 = vmatpush.bf16.msrb.mxu3 %v2934_v0 }
 0x1a3   :  { %v907_v54 = vpop.f32.mrf.mxu2  ;;  %v812_v47 = vpop.f32.mrf.mxu0  ;;  %v1458_v36 = vmul.f32 0.5, %v1394_v45  ;;  %3248 = vtanh.f32 %v1270_v11  ;;  %v1518_v28 = vmul.f32 %v1454_v19, %v4051_v6 }
 0x1a4   :  { %v1143_v56 = vmul.f32 0.044715, %v1079_v34  ;;  %v908_v53 = vadd.f32 %v907_v54, %v3808_v40  ;;  %v956_v18 = vpop.f32.mrf.mxu3  ;;  %v1146_v57 = vmul.f32 0.044715, %v1082_v8  ;;  %v813_v35 = vadd.f32 %v812_v47, %v3789_v59 }
 0x1a5   :  { %v861_v51 = vpop.f32.mrf.mxu1  ;;  %v1522_v42 = vmul.f32 %v1458_v36, %v4073_v58  ;;  %v1455_v24 = vmul.f32 0.5, %v1391_v29 }
 0x1a6   :  { %v1207_v25 = vadd.f32 %v1143_v56, %v4113_v41  ;;  %v4134_v60 = vadd.f32 %v956_v18, %v908_v53  ;;  %v1210_v2 = vadd.f32 %v1146_v57, %v4116_v14  ;;  %v4139_v22 = vadd.f32 %v861_v51, %v813_v35  ;;  %2005 = vmatmul.bf16.gmra.mxu0 %v3855_v9 }
 0x1a7   :  { %2054 = vmatmul.bf16.gmra.mxu1 %v4130_v46  ;;  %v4145_v1 = vpack.c.bf16 %v1522_v42, %v1518_v28  ;;  %v1519_v36 = vmul.f32 %v1455_v24, %v4070_v38 }
 0x1a8   :  { %v3247_v12 = vpop.eup %3246  ;;  %v1271_v11 = vmul.f32 0.7978846, %v1207_v25  ;;  %v1019_v26 = vmul.f32 %v4134_v60, %v4134_v60  ;;  %v1274_v17 = vmul.f32 0.7978846, %v1210_v2  ;;  %v1022_v6 = vmul.f32 %v4139_v22, %v4139_v22  ;;  %v3095_v2 = vld [vmem:[#allocation8 + $0x104] sm:$0xf] }
 0x1a9   :  { %v1395_v58 = vadd.f32 1.0, %v3247_v12  ;;  %2093 = vmatmul.bf16.gmra.mxu2 %v4145_v1  ;;  %v3249_v34 = vpop.eup %3248  ;;  %v2859_v12 = vld [vmem:[#allocation8 + $0x108] sm:$0xf0] }
 0x1aa   :  { %v1083_v33 = vmul.f32 %v1019_v26, %v4134_v60  ;;  %v1086_v45 = vmul.f32 %v1022_v6, %v4139_v22  ;;  %3250 = vtanh.f32 %v1274_v17  ;;  %v1398_v29 = vadd.f32 1.0, %v3249_v34  ;;  %v3111_v6 = vld [vmem:[#allocation8 + $0x184] sm:$0xf] }
 0x1ab   :  { %v910_v19 = vpop.f32.mrf.mxu2  ;;  %v1459_v55 = vmul.f32 0.5, %v1395_v58  ;;  %3252 = vtanh.f32 %v1271_v11  ;;  %v814_v56 = vpop.f32.mrf.mxu0  ;;  %v2862_v38 = vor.u32 %v3095_v2, %v2859_v12 }
 0x1ac   :  { %v1147_v8 = vmul.f32 0.044715, %v1083_v33  ;;  %v911_v54 = vadd.f32 %v910_v19, %v3808_v40  ;;  %v959_v0 = vpop.f32.mrf.mxu3  ;;  %v1150_v53 = vmul.f32 0.044715, %v1086_v45  ;;  %v815_v18 = vadd.f32 %v814_v56, %v3789_v59  ;;  %v2923_v45 = vld [vmem:[#allocation8 + $0x188] sm:$0xf0] }
 0x1ad   :  { %v863_v47 = vpop.f32.mrf.mxu1  ;;  %v1523_v57 = vmul.f32 %v1459_v55, %v4091_v61  ;;  %v1462_v34 = vmul.f32 0.5, %v1398_v29  ;;  %2263 = vmatpush.bf16.msrb.mxu2 %v2862_v38 }
 0x1ae   :  { %v1211_v35 = vadd.f32 %v1147_v8, %v4134_v60  ;;  %v4157_v51 = vadd.f32 %v959_v0, %v911_v54  ;;  %v1214_v25 = vadd.f32 %v1150_v53, %v4139_v22  ;;  %v4160_v28 = vadd.f32 %v863_v47, %v815_v18 }
 0x1af   :  { %v4162_v42 = vpack.c.bf16 %v1523_v57, %v1519_v36  ;;  %v2926_v8 = vor.u32 %v3111_v6, %v2923_v45 }
 0x1b0   :  { %v1275_v11 = vmul.f32 0.7978846, %v1211_v35  ;;  %v1023_v59 = vmul.f32 %v4157_v51, %v4157_v51  ;;  %v3251_v26 = vpop.eup %3250  ;;  %v1278_v61 = vmul.f32 0.7978846, %v1214_v25  ;;  %v1026_v17 = vmul.f32 %v4160_v28, %v4160_v28 }
 0x1b1   :  { %2142 = vmatmul.bf16.gmra.mxu3 %v4162_v42  ;;  %v3253_v58 = vpop.eup %3252  ;;  %v1402_v33 = vadd.f32 1.0, %v3251_v26  ;;  %v1526_v25 = vmul.f32 %v1462_v34, %v4095_v32 }
 0x1b2   :  { %v1087_v24 = vmul.f32 %v1023_v59, %v4157_v51  ;;  %3254 = vtanh.f32 %v1275_v11  ;;  %v1090_v19 = vmul.f32 %v1026_v17, %v4160_v28  ;;  %v1399_v57 = vadd.f32 1.0, %v3253_v58  ;;  %2312 = vmatpush.bf16.msrb.mxu3 %v2926_v8 }
 0x1b3   :  { %v912_v55 = vpop.f32.mrf.mxu2  ;;  %v4172_v56 = vpop.f32.mrf.mxu0  ;;  %v1466_v53 = vmul.f32 0.5, %v1402_v33  ;;  %3256 = vtanh.f32 %v1278_v61 }
 0x1b4   :  { %v1151_v54 = vmul.f32 0.044715, %v1087_v24  ;;  %v913_v0 = vadd.f32 %v912_v55, %v3808_v40  ;;  %v1154_v18 = vmul.f32 0.044715, %v1090_v19  ;;  %v961_v47 = vpop.f32.mrf.mxu3  ;;  %v1463_v17 = vmul.f32 0.5, %v1399_v57 }
 0x1b5   :  { %v4174_v36 = vpop.f32.mrf.mxu1  ;;  %v1530_v2 = vmul.f32 %v1466_v53, %v4116_v14 }
 0x1b6   :  { %v1215_v35 = vadd.f32 %v1151_v54, %v4157_v51  ;;  %v962_v29 = vadd.f32 %v961_v47, %v913_v0  ;;  %v1218_v12 = vadd.f32 %v1154_v18, %v4160_v28  ;;  %2166 = vmatmul.bf16.vlgmr.msrb.gmra.mxu0 %v3585_v63  ;;  %v1527_v33 = vmul.f32 %v1463_v17, %v4113_v41 }
 0x1b7   :  { %2215 = vmatmul.bf16.vlgmr.msrb.gmra.mxu1 %v3603_v37  ;;  %v4182_v38 = vpack.c.bf16 %v1530_v2, %v1526_v25 }
 0x1b8   :  { %v3255_v40 = vpop.eup %3254  ;;  %v1279_v11 = vmul.f32 0.7978846, %v1215_v35  ;;  %v1027_v59 = vmul.f32 %v962_v29, %v962_v29  ;;  %v1282_v26 = vmul.f32 0.7978846, %v1218_v12 }
 0x1b9   :  { %v1403_v61 = vadd.f32 1.0, %v3255_v40  ;;  %2098 = vmatmul.bf16.gmra.mxu2 %v4182_v38  ;;  %v3257_v32 = vpop.eup %3256 }
 0x1ba   :  { %v1091_v6 = vmul.f32 %v1027_v59, %v962_v29  ;;  %3258 = vtanh.f32 %v1282_v26  ;;  %v1406_v45 = vadd.f32 1.0, %v3257_v32 }
 0x1bb   :  { %v1467_v58 = vmul.f32 0.5, %v1403_v61  ;;  %3260 = vtanh.f32 %v1279_v11  ;;  %v1973_v24 = vpop.f32.mrf.mxu0 }
 0x1bc   :  { %v1155_v14 = vmul.f32 0.044715, %v1091_v6  ;;  %v1470_v53 = vmul.f32 0.5, %v1406_v45 }
 0x1bd   :  { %v2022_v63 = vpop.f32.mrf.mxu1  ;;  %v1531_v34 = vmul.f32 %v1467_v58, %v4134_v60 }
 0x1be   :  { %v1219_v37 = vadd.f32 %v1155_v14, %v962_v29  ;;  %v1534_v41 = vmul.f32 %v1470_v53, %v4139_v22 }
 0x1bf   :  { %v4187_v19 = vpack.c.bf16 %v1531_v34, %v1527_v33 }
 0x1c0   :  { %v1283_v55 = vmul.f32 0.7978846, %v1219_v37  ;;  %v3259_v8 = vpop.eup %3258 }
 0x1c1   :  { %2147 = vmatmul.bf16.gmra.mxu3 %v4187_v19  ;;  %v3261_v54 = vpop.eup %3260  ;;  %v1410_v0 = vadd.f32 1.0, %v3259_v8 }
 0x1c2   :  { %3262 = vtanh.f32 %v1283_v55  ;;  %v1407_v35 = vadd.f32 1.0, %v3261_v54 }
 0x1c3   :  { %v1976_v18 = vpop.f32.mrf.mxu0  ;;  %v1474_v47 = vmul.f32 0.5, %v1410_v0 }
 0x1c4   :  { %v1471_v40 = vmul.f32 0.5, %v1407_v35 }
 0x1c5   :  { %v2025_v57 = vpop.f32.mrf.mxu1  ;;  %v1538_v60 = vmul.f32 %v1474_v47, %v4160_v28 }
 0x1c6   :  { %2171 = vmatmul.bf16.gmra.mxu0 %v3629_v21  ;;  %v1535_v61 = vmul.f32 %v1471_v40, %v4157_v51 }
 0x1c7   :  { %2220 = vmatmul.bf16.gmra.mxu1 %v3650_v20  ;;  %v4194_v2 = vpack.c.bf16 %v1538_v60, %v1534_v41  ;;  %v4204_v20 = vld [vmem:[%s4284_s4] sm:$0x3]  ;;  %s3401_s4 = smov [#allocation10]  }
 0x1c8   :  { %v3263_v25 = vpop.eup %3262  ;;  %v4209_v6 = vperm.slane %v4204_v20, 0  ;;  %s2390_s15 = sshll.u32 %s3401_s4, 4  ;;  %s2391_s15 = int_to_ptr.vmem [resolvable:$true] %s2390_s15 }
 0x1c9   :  { %v1411_v12 = vadd.f32 1.0, %v3263_v25  ;;  %2103 = vmatmul.bf16.gmra.mxu2 %v4194_v2 }
 0x1cb   :  { %v1475_v11 = vmul.f32 0.5, %v1411_v12  ;;  %v1978_v59 = vpop.f32.mrf.mxu0 }
 0x1cd   :  { %v2027_v26 = vpop.f32.mrf.mxu1  ;;  %v1539_v17 = vmul.f32 %v1475_v11, %v962_v29  ;;  %v1972_v29 = vadd.f32 %v4172_v56, %v4209_v6 }
 0x1cf   :  { %v4198_v22 = vpack.c.bf16 %v1539_v17, %v1535_v61  ;;  %v2021_v14 = vadd.f32 %v4174_v36, %v1972_v29 }
 0x1d1   :  { %2152 = vmatmul.bf16.gmra.mxu3 %v4198_v22 }
 0x1d3   :  { %v1981_v21 = vpop.f32.mrf.mxu0 }
 0x1d5   :  { %v2030_v28 = vpop.f32.mrf.mxu1 }
 0x1d6   :  { %2176 = vmatmul.bf16.gmra.mxu0 %v3669_v50 }
 0x1d7   :  { %2225 = vmatmul.bf16.gmra.mxu1 %v3688_v43  ;;  %v1974_v43 = vadd.f32 %v1973_v24, %v4209_v6 }
 0x1d9   :  { %2264 = vmatmul.bf16.vlgmr.msrb.gmra.mxu2 %v3897_v10  ;;  %v2023_v10 = vadd.f32 %v2022_v63, %v1974_v43 }
 0x1db   :  { %v1983_v51 = vpop.f32.mrf.mxu0 }
 0x1dc   :  { %v2069_v58 = vpop.f32.mrf.mxu2 }
 0x1dd   :  { %v2032_v32 = vpop.f32.mrf.mxu1  ;;  %v2070_v33 = vadd.f32 %v2069_v58, %v2021_v14 }
 0x1e1   :  { %2313 = vmatmul.bf16.vlgmr.msrb.gmra.mxu3 %v3916_v31  ;;  %v1977_v31 = vadd.f32 %v1976_v18, %v4209_v6 }
 0x1e3   :  { %v1986_v50 = vpop.f32.mrf.mxu0  ;;  %v2026_v24 = vadd.f32 %v2025_v57, %v1977_v31 }
 0x1e4   :  { %v2118_v34 = vpop.f32.mrf.mxu3  ;;  %v2071_v55 = vpop.f32.mrf.mxu2 }
 0x1e5   :  { %v2119_v37 = vadd.f32 %v2118_v34, %v2070_v33  ;;  %v2035_v45 = vpop.f32.mrf.mxu1  ;;  %v2072_v56 = vadd.f32 %v2071_v55, %v2023_v10 }
 0x1e6   :  { %2181 = vmatmul.bf16.gmra.mxu0 %v3704_v49 }
 0x1e7   :  { %2354 = vst [vmem:[#allocation10] sm:$0xff] %v2119_v37  ;;  %2230 = vmatmul.bf16.gmra.mxu1 %v3721_v7  ;;  %v1979_v7 = vadd.f32 %v1978_v59, %v4209_v6 }
 0x1e9   :  { %2269 = vmatmul.bf16.gmra.mxu2 %v3954_v3  ;;  %v2028_v18 = vadd.f32 %v2027_v26, %v1979_v7 }
 0x1eb   :  { %v1988_v8 = vpop.f32.mrf.mxu0 }
 0x1ec   :  { %v2120_v36 = vpop.f32.mrf.mxu3  ;;  %v2074_v53 = vpop.f32.mrf.mxu2 }
 0x1ed   :  { %v2121_v54 = vadd.f32 %v2120_v36, %v2072_v56  ;;  %v2037_v0 = vpop.f32.mrf.mxu1  ;;  %v2075_v47 = vadd.f32 %v2074_v53, %v2026_v24 }
 0x1ef   :  { %2356 = vst [vmem:[#allocation10 + $0x10] sm:$0xff] %v2121_v54 }
 0x1f1   :  { %2318 = vmatmul.bf16.gmra.mxu3 %v3979_v13  ;;  %v1982_v13 = vadd.f32 %v1981_v21, %v4209_v6 }
 0x1f3   :  { %v1991_v49 = vpop.f32.mrf.mxu0  ;;  %v2031_v59 = vadd.f32 %v2030_v28, %v1982_v13 }
 0x1f4   :  { %v2123_v35 = vpop.f32.mrf.mxu3  ;;  %v2076_v3 = vpop.f32.mrf.mxu2 }
 0x1f5   :  { %v2124_v63 = vadd.f32 %v2123_v35, %v2075_v47  ;;  %v2040_v41 = vpop.f32.mrf.mxu1  ;;  %v2077_v60 = vadd.f32 %v2076_v3, %v2028_v18 }
 0x1f6   :  { %2186 = vmatmul.bf16.gmra.mxu0 %v3737_v52 }
 0x1f7   :  { %2358 = vst [vmem:[#allocation10 + $0x20] sm:$0xff] %v2124_v63  ;;  %2235 = vmatmul.bf16.gmra.mxu1 %v3987_v62  ;;  %v1984_v62 = vadd.f32 %v1983_v51, %v4209_v6 }
 0x1f9   :  { %2274 = vmatmul.bf16.gmra.mxu2 %v4012_v23  ;;  %v2033_v21 = vadd.f32 %v2032_v32, %v1984_v62 }
 0x1fb   :  { %v1993_v25 = vpop.f32.mrf.mxu0 }
 0x1fc   :  { %v2125_v57 = vpop.f32.mrf.mxu3  ;;  %v2079_v11 = vpop.f32.mrf.mxu2 }
 0x1fd   :  { %v2126_v12 = vadd.f32 %v2125_v57, %v2077_v60  ;;  %v2042_v40 = vpop.f32.mrf.mxu1  ;;  %v2080_v61 = vadd.f32 %v2079_v11, %v2031_v59 }
 0x1ff   :  { %2360 = vst [vmem:[#allocation10 + $0x30] sm:$0xff] %v2126_v12 }
 0x201   :  { %2323 = vmatmul.bf16.gmra.mxu3 %v4031_v30  ;;  %v1987_v30 = vadd.f32 %v1986_v50, %v4209_v6 }
 0x203   :  { %v1996_v52 = vpop.f32.mrf.mxu0  ;;  %v2036_v43 = vadd.f32 %v2035_v45, %v1987_v30 }
 0x204   :  { %v2128_v17 = vpop.f32.mrf.mxu3  ;;  %v2081_v29 = vpop.f32.mrf.mxu2 }
 0x205   :  { %v2129_v26 = vadd.f32 %v2128_v17, %v2080_v61  ;;  %v2045_v23 = vpop.f32.mrf.mxu1  ;;  %v2082_v58 = vadd.f32 %v2081_v29, %v2033_v21 }
 0x206   :  { %2191 = vmatmul.bf16.gmra.mxu0 %v3769_v27 }
 0x207   :  { %2362 = vst [vmem:[#allocation10 + $0x40] sm:$0xff] %v2129_v26  ;;  %2240 = vmatmul.bf16.gmra.mxu1 %v4035_v15  ;;  %v1989_v15 = vadd.f32 %v1988_v8, %v4209_v6 }
 0x209   :  { %2279 = vmatmul.bf16.gmra.mxu2 %v4057_v4  ;;  %v2038_v4 = vadd.f32 %v2037_v0, %v1989_v15 }
 0x20b   :  { %v1998_v14 = vpop.f32.mrf.mxu0 }
 0x20c   :  { %v2130_v28 = vpop.f32.mrf.mxu3  ;;  %v2084_v34 = vpop.f32.mrf.mxu2 }
 0x20d   :  { %v2131_v33 = vadd.f32 %v2130_v28, %v2082_v58  ;;  %v2047_v51 = vpop.f32.mrf.mxu1  ;;  %v2085_v37 = vadd.f32 %v2084_v34, %v2036_v43 }
 0x20f   :  { %2364 = vst [vmem:[#allocation10 + $0x50] sm:$0xff] %v2131_v33 }
 0x211   :  { %2328 = vmatmul.bf16.gmra.mxu3 %v4075_v39  ;;  %v1992_v39 = vadd.f32 %v1991_v49, %v4209_v6 }
 0x213   :  { %v2001_v27 = vpop.f32.mrf.mxu0  ;;  %v2041_v8 = vadd.f32 %v2040_v41, %v1992_v39 }
 0x214   :  { %v2133_v55 = vpop.f32.mrf.mxu3  ;;  %v2086_v10 = vpop.f32.mrf.mxu2  ;;  %v2002_v61 = vadd.f32 %v2001_v27, %v4209_v6 }
 0x215   :  { %v2134_v32 = vadd.f32 %v2133_v55, %v2085_v37  ;;  %v2050_v50 = vpop.f32.mrf.mxu1  ;;  %v2087_v56 = vadd.f32 %v2086_v10, %v2038_v4 }
 0x216   :  { %2196 = vmatmul.bf16.gmra.mxu0 %v3810_v5 }
 0x217   :  { %2366 = vst [vmem:[#allocation10 + $0x60] sm:$0xff] %v2134_v32  ;;  %2245 = vmatmul.bf16.gmra.mxu1 %v4084_v16  ;;  %v1994_v16 = vadd.f32 %v1993_v25, %v4209_v6  ;;  %v1999_v25 = vadd.f32 %v1998_v14, %v4209_v6 }
 0x219   :  { %2284 = vmatmul.bf16.gmra.mxu2 %v4101_v48  ;;  %v2043_v35 = vadd.f32 %v2042_v40, %v1994_v16  ;;  %v2048_v12 = vadd.f32 %v2047_v51, %v1999_v25 }
 0x21b   :  { %v2003_v54 = vpop.f32.mrf.mxu0 }
 0x21c   :  { %v2135_v45 = vpop.f32.mrf.mxu3  ;;  %v2089_v31 = vpop.f32.mrf.mxu2 }
 0x21d   :  { %v2136_v36 = vadd.f32 %v2135_v45, %v2087_v56  ;;  %v2090_v53 = vadd.f32 %v2089_v31, %v2041_v8  ;;  %v2052_v24 = vpop.f32.mrf.mxu1 }
 0x21f   :  { %2368 = vst [vmem:[#allocation10 + $0x70] sm:$0xff] %v2136_v36 }
 0x221   :  { %2333 = vmatmul.bf16.gmra.mxu3 %v4118_v44  ;;  %v1997_v44 = vadd.f32 %v1996_v52, %v4209_v6 }
 0x223   :  { %v2006_v48 = vpop.f32.mrf.mxu0  ;;  %v2046_v18 = vadd.f32 %v2045_v23, %v1997_v44  ;;  %v2004_v23 = vadd.f32 %v2003_v54, %v4209_v6 }
 0x224   :  { %v2138_v5 = vpop.f32.mrf.mxu3  ;;  %v2091_v47 = vpop.f32.mrf.mxu2  ;;  %v2007_v34 = vadd.f32 %v2006_v48, %v4209_v6 }
 0x225   :  { %v2139_v0 = vadd.f32 %v2138_v5, %v2090_v53  ;;  %v2092_v49 = vadd.f32 %v2091_v47, %v2043_v35  ;;  %v2055_v3 = vpop.f32.mrf.mxu1 }
 0x226   :  { %2201 = vmatmul.bf16.gmra.mxu0 %v3855_v9  ;;  %v2056_v37 = vadd.f32 %v2055_v3, %v2007_v34 }
 0x227   :  { %2370 = vst [vmem:[#allocation10 + $0x80] sm:$0xff] %v2139_v0  ;;  %2250 = vmatmul.bf16.gmra.mxu1 %v4130_v46 }
 0x229   :  { %2289 = vmatmul.bf16.gmra.mxu2 %v4145_v1 }
 0x22b   :  { %v2008_v60 = vpop.f32.mrf.mxu0 }
 0x22c   :  { %v2140_v7 = vpop.f32.mrf.mxu3  ;;  %v2094_v41 = vpop.f32.mrf.mxu2  ;;  %v2009_v15 = vadd.f32 %v2008_v60, %v4209_v6 }
 0x22d   :  { %v2141_v63 = vadd.f32 %v2140_v7, %v2092_v49  ;;  %v2095_v57 = vadd.f32 %v2094_v41, %v2046_v18  ;;  %v2057_v1 = vpop.f32.mrf.mxu1 }
 0x22f   :  { %2372 = vst [vmem:[#allocation10 + $0x90] sm:$0xff] %v2141_v63 }
 0x231   :  { %2338 = vmatmul.bf16.gmra.mxu3 %v4162_v42  ;;  %v2051_v42 = vadd.f32 %v2050_v50, %v2002_v61  ;;  %v4256_v50 = vperm.slane %v4204_v20, 1 }
 0x233   :  { %v2167_v11 = vpop.f32.mrf.mxu0 }
 0x234   :  { %v2143_v9 = vpop.f32.mrf.mxu3  ;;  %v2096_v13 = vpop.f32.mrf.mxu2  ;;  %v2168_v36 = vadd.f32 %v2167_v11, %v4256_v50 }
 0x235   :  { %v2144_v46 = vadd.f32 %v2143_v9, %v2095_v57  ;;  %v2097_v40 = vadd.f32 %v2096_v13, %v2048_v12  ;;  %v2216_v62 = vpop.f32.mrf.mxu1 }
 0x236   :  { %v2217_v8 = vadd.f32 %v2216_v62, %v2168_v36 }
 0x237   :  { %2374 = vst [vmem:[#allocation10 + $0xa0] sm:$0xff] %v2144_v46 }
 0x239   :  { %2294 = vmatmul.bf16.gmra.mxu2 %v4182_v38  ;;  %v2053_v38 = vadd.f32 %v2052_v24, %v2004_v23 }
 0x23b   :  { %v2169_v28 = vpop.f32.mrf.mxu0 }
 0x23c   :  { %v2145_v59 = vpop.f32.mrf.mxu3  ;;  %v2099_v52 = vpop.f32.mrf.mxu2  ;;  %v2170_v5 = vadd.f32 %v2169_v28, %v4256_v50 }
 0x23d   :  { %v2146_v17 = vadd.f32 %v2145_v59, %v2097_v40  ;;  %v2100_v26 = vadd.f32 %v2099_v52, %v2051_v42  ;;  %v2218_v30 = vpop.f32.mrf.mxu1 }
 0x23e   :  { %v2219_v20 = vadd.f32 %v2218_v30, %v2170_v5 }
 0x23f   :  { %2376 = vst [vmem:[#allocation10 + $0xb0] sm:$0xff] %v2146_v17 }
 0x241   :  { %2343 = vmatmul.bf16.gmra.mxu3 %v4187_v19 }
 0x243   :  { %v2172_v19 = vpop.f32.mrf.mxu0 }
 0x244   :  { %v2148_v29 = vpop.f32.mrf.mxu3  ;;  %v2101_v58 = vpop.f32.mrf.mxu2  ;;  %v2173_v49 = vadd.f32 %v2172_v19, %v4256_v50 }
 0x245   :  { %v2149_v21 = vadd.f32 %v2148_v29, %v2100_v26  ;;  %v2102_v14 = vadd.f32 %v2101_v58, %v2053_v38  ;;  %v2221_v4 = vpop.f32.mrf.mxu1 }
 0x246   :  { %v2222_v41 = vadd.f32 %v2221_v4, %v2173_v49 }
 0x247   :  { %2378 = vst [vmem:[#allocation10 + $0xc0] sm:$0xff] %v2149_v21 }
 0x249   :  { %2299 = vmatmul.bf16.gmra.mxu2 %v4194_v2  ;;  %v2058_v2 = vadd.f32 %v2057_v1, %v2009_v15 }
 0x24b   :  { %v2174_v56 = vpop.f32.mrf.mxu0 }
 0x24c   :  { %v2150_v33 = vpop.f32.mrf.mxu3  ;;  %v2104_v43 = vpop.f32.mrf.mxu2  ;;  %v2175_v57 = vadd.f32 %v2174_v56, %v4256_v50 }
 0x24d   :  { %v2151_v51 = vadd.f32 %v2150_v33, %v2102_v14  ;;  %v2105_v55 = vadd.f32 %v2104_v43, %v2056_v37 }
 0x24f   :  { %2380 = vst [vmem:[#allocation10 + $0xd0] sm:$0xff] %v2151_v51 }
 0x251   :  { %2348 = vmatmul.bf16.gmra.mxu3 %v4198_v22  ;;  %v2223_v22 = vpop.f32.mrf.mxu1 }
 0x252   :  { %v2224_v13 = vadd.f32 %v2223_v22, %v2175_v57 }
 0x253   :  { %v2177_v6 = vpop.f32.mrf.mxu0 }
 0x254   :  { %v2153_v27 = vpop.f32.mrf.mxu3  ;;  %v2106_v10 = vpop.f32.mrf.mxu2  ;;  %v2178_v40 = vadd.f32 %v2177_v6, %v4256_v50 }
 0x255   :  { %v2154_v32 = vadd.f32 %v2153_v27, %v2105_v55  ;;  %v2107_v45 = vadd.f32 %v2106_v10, %v2058_v2 }
 0x257   :  { %2382 = vst [vmem:[#allocation10 + $0xe0] sm:$0xff] %v2154_v32 }
 0x259   :  { %v2226_v47 = vpop.f32.mrf.mxu1 }
 0x25a   :  { %v2227_v17 = vadd.f32 %v2226_v47, %v2178_v40 }
 0x25b   :  { %v2179_v63 = vpop.f32.mrf.mxu0 }
 0x25c   :  { %v2155_v39 = vpop.f32.mrf.mxu3  ;;  %v2265_v54 = vpop.f32.mrf.mxu2  ;;  %v2180_v26 = vadd.f32 %v2179_v63, %v4256_v50 }
 0x25d   :  { %v2156_v31 = vadd.f32 %v2155_v39, %v2107_v45  ;;  %v2266_v53 = vadd.f32 %v2265_v54, %v2217_v8 }
 0x25f   :  { %2384 = vst [vmem:[#allocation10 + $0xf0] sm:$0xff] %v2156_v31 }
 0x261   :  { %v2228_v18 = vpop.f32.mrf.mxu1 }
 0x262   :  { %v2229_v58 = vadd.f32 %v2228_v18, %v2180_v26 }
 0x263   :  { %v2182_v46 = vpop.f32.mrf.mxu0 }
 0x264   :  { %v2314_v24 = vpop.f32.mrf.mxu3  ;;  %v2267_v0 = vpop.f32.mrf.mxu2  ;;  %v2183_v30 = vadd.f32 %v2182_v46, %v4256_v50 }
 0x265   :  { %v2315_v16 = vadd.f32 %v2314_v24, %v2266_v53  ;;  %v2268_v48 = vadd.f32 %v2267_v0, %v2219_v20 }
 0x267   :  { %2355 = vst [vmem:[#allocation10 + $0x8] sm:$0xff] %v2315_v16 }
 0x269   :  { %v2231_v61 = vpop.f32.mrf.mxu1 }
 0x26a   :  { %v2232_v51 = vadd.f32 %v2231_v61, %v2183_v30 }
 0x26b   :  { %v2184_v52 = vpop.f32.mrf.mxu0 }
 0x26c   :  { %v2316_v35 = vpop.f32.mrf.mxu3  ;;  %v2270_v44 = vpop.f32.mrf.mxu2  ;;  %v2185_v55 = vadd.f32 %v2184_v52, %v4256_v50 }
 0x26d   :  { %v2317_v7 = vadd.f32 %v2316_v35, %v2268_v48  ;;  %v2271_v3 = vadd.f32 %v2270_v44, %v2222_v41 }
 0x26f   :  { %2357 = vst [vmem:[#allocation10 + $0x18] sm:$0xff] %v2317_v7 }
 0x271   :  { %v2233_v21 = vpop.f32.mrf.mxu1 }
 0x272   :  { %v2234_v10 = vadd.f32 %v2233_v21, %v2185_v55 }
 0x273   :  { %v2187_v38 = vpop.f32.mrf.mxu0 }
 0x274   :  { %v2319_v60 = vpop.f32.mrf.mxu3  ;;  %v2272_v25 = vpop.f32.mrf.mxu2  ;;  %v2188_v45 = vadd.f32 %v2187_v38, %v4256_v50 }
 0x275   :  { %v2320_v9 = vadd.f32 %v2319_v60, %v2271_v3  ;;  %v2273_v1 = vadd.f32 %v2272_v25, %v2224_v13 }
 0x277   :  { %2359 = vst [vmem:[#allocation10 + $0x28] sm:$0xff] %v2320_v9 }
 0x279   :  { %v2236_v43 = vpop.f32.mrf.mxu1 }
 0x27a   :  { %v2237_v54 = vadd.f32 %v2236_v43, %v2188_v45 }
 0x27b   :  { %v2189_v32 = vpop.f32.mrf.mxu0 }
 0x27c   :  { %v2321_v12 = vpop.f32.mrf.mxu3  ;;  %v2275_v59 = vpop.f32.mrf.mxu2  ;;  %v2190_v53 = vadd.f32 %v2189_v32, %v4256_v50 }
 0x27d   :  { %v2322_v11 = vadd.f32 %v2321_v12, %v2273_v1  ;;  %v2276_v42 = vadd.f32 %v2275_v59, %v2227_v17 }
 0x27f   :  { %2361 = vst [vmem:[#allocation10 + $0x38] sm:$0xff] %v2322_v11 }
 0x281   :  { %v2238_v2 = vpop.f32.mrf.mxu1 }
 0x282   :  { %v2239_v16 = vadd.f32 %v2238_v2, %v2190_v53 }
 0x283   :  { %v2192_v31 = vpop.f32.mrf.mxu0 }
 0x284   :  { %v2324_v62 = vpop.f32.mrf.mxu3  ;;  %v2277_v23 = vpop.f32.mrf.mxu2  ;;  %v2193_v48 = vadd.f32 %v2192_v31, %v4256_v50 }
 0x285   :  { %v2325_v29 = vadd.f32 %v2324_v62, %v2276_v42  ;;  %v2278_v28 = vadd.f32 %v2277_v23, %v2229_v58 }
 0x287   :  { %2363 = vst [vmem:[#allocation10 + $0x48] sm:$0xff] %v2325_v29 }
 0x289   :  { %v2241_v5 = vpop.f32.mrf.mxu1 }
 0x28a   :  { %v2242_v44 = vadd.f32 %v2241_v5, %v2193_v48 }
 0x28b   :  { %v2194_v0 = vpop.f32.mrf.mxu0 }
 0x28c   :  { %v2326_v14 = vpop.f32.mrf.mxu3  ;;  %v2280_v34 = vpop.f32.mrf.mxu2  ;;  %v2195_v18 = vadd.f32 %v2194_v0, %v4256_v50 }
 0x28d   :  { %v2327_v33 = vadd.f32 %v2326_v14, %v2278_v28  ;;  %v2281_v19 = vadd.f32 %v2280_v34, %v2232_v51 }
 0x28f   :  { %2365 = vst [vmem:[#allocation10 + $0x58] sm:$0xff] %v2327_v33 }
 0x291   :  { %v2243_v7 = vpop.f32.mrf.mxu1 }
 0x292   :  { %v2244_v9 = vadd.f32 %v2243_v7, %v2195_v18 }
 0x293   :  { %v2197_v41 = vpop.f32.mrf.mxu0 }
 0x294   :  { %v2329_v37 = vpop.f32.mrf.mxu3  ;;  %v2282_v15 = vpop.f32.mrf.mxu2  ;;  %v2198_v1 = vadd.f32 %v2197_v41, %v4256_v50 }
 0x295   :  { %v2330_v27 = vadd.f32 %v2329_v37, %v2281_v19  ;;  %v2283_v4 = vadd.f32 %v2282_v15, %v2234_v10 }
 0x297   :  { %2367 = vst [vmem:[#allocation10 + $0x68] sm:$0xff] %v2330_v27 }
 0x299   :  { %v2246_v25 = vpop.f32.mrf.mxu1 }
 0x29a   :  { %v2247_v59 = vadd.f32 %v2246_v25, %v2198_v1 }
 0x29b   :  { %v2199_v11 = vpop.f32.mrf.mxu0 }
 0x29c   :  { %v2331_v56 = vpop.f32.mrf.mxu3  ;;  %v2285_v36 = vpop.f32.mrf.mxu2  ;;  %v2200_v42 = vadd.f32 %v2199_v11, %v4256_v50 }
 0x29d   :  { %v2332_v39 = vadd.f32 %v2331_v56, %v2283_v4  ;;  %v2286_v22 = vadd.f32 %v2285_v36, %v2237_v54 }
 0x29f   :  { %2369 = vst [vmem:[#allocation10 + $0x78] sm:$0xff] %v2332_v39 }
 0x2a1   :  { %v2248_v17 = vpop.f32.mrf.mxu1 }
 0x2a2   :  { %v2249_v23 = vadd.f32 %v2248_v17, %v2200_v42 }
 0x2a3   :  { %v2202_v29 = vpop.f32.mrf.mxu0 }
 0x2a4   :  { %v2334_v8 = vpop.f32.mrf.mxu3  ;;  %v2287_v24 = vpop.f32.mrf.mxu2  ;;  %v2203_v28 = vadd.f32 %v2202_v29, %v4256_v50 }
 0x2a5   :  { %v2335_v6 = vadd.f32 %v2334_v8, %v2286_v22  ;;  %v2288_v20 = vadd.f32 %v2287_v24, %v2239_v16 }
 0x2a7   :  { %2371 = vst [vmem:[#allocation10 + $0x88] sm:$0xff] %v2335_v6 }
 0x2a9   :  { %v2251_v14 = vpop.f32.mrf.mxu1 }
 0x2aa   :  { %v2252_v33 = vadd.f32 %v2251_v14, %v2203_v28 }
 0x2ab   :  { %v2204_v34 = vpop.f32.mrf.mxu0 }
 0x2ac   :  { %v2336_v47 = vpop.f32.mrf.mxu3  ;;  %v2290_v49 = vpop.f32.mrf.mxu2  ;;  %v2205_v19 = vadd.f32 %v2204_v34, %v4256_v50 }
 0x2ad   :  { %v2337_v35 = vadd.f32 %v2336_v47, %v2288_v20  ;;  %v2291_v63 = vadd.f32 %v2290_v49, %v2242_v44 }
 0x2af   :  { %2373 = vst [vmem:[#allocation10 + $0x98] sm:$0xff] %v2337_v35 }
 0x2b1   :  { %v2253_v55 = vpop.f32.mrf.mxu1 }
 0x2b2   :  { %v2254_v15 = vadd.f32 %v2253_v55, %v2205_v19 }
 0x2b4   :  { %v2339_v3 = vpop.f32.mrf.mxu3  ;;  %v2292_v57 = vpop.f32.mrf.mxu2 }
 0x2b5   :  { %v2340_v60 = vadd.f32 %v2339_v3, %v2291_v63  ;;  %v2293_v46 = vadd.f32 %v2292_v57, %v2244_v9 }
 0x2b7   :  { %2375 = vst [vmem:[#allocation10 + $0xa8] sm:$0xff] %v2340_v60 }
 0x2bc   :  { %v2341_v13 = vpop.f32.mrf.mxu3  ;;  %v2295_v40 = vpop.f32.mrf.mxu2 }
 0x2bd   :  { %v2342_v12 = vadd.f32 %v2341_v13, %v2293_v46  ;;  %v2296_v61 = vadd.f32 %v2295_v40, %v2247_v59 }
 0x2bf   :  { %2377 = vst [vmem:[#allocation10 + $0xb8] sm:$0xff] %v2342_v12 }
 0x2c4   :  { %v2344_v52 = vpop.f32.mrf.mxu3  ;;  %v2297_v26 = vpop.f32.mrf.mxu2 }
 0x2c5   :  { %v2345_v62 = vadd.f32 %v2344_v52, %v2296_v61  ;;  %v2298_v21 = vadd.f32 %v2297_v26, %v2249_v23 }
 0x2c7   :  { %2379 = vst [vmem:[#allocation10 + $0xc8] sm:$0xff] %v2345_v62 }
 0x2cc   :  { %v2346_v58 = vpop.f32.mrf.mxu3  ;;  %v2300_v30 = vpop.f32.mrf.mxu2 }
 0x2cd   :  { %v2347_v38 = vadd.f32 %v2346_v58, %v2298_v21  ;;  %v2301_v51 = vadd.f32 %v2300_v30, %v2252_v33 }
 0x2cf   :  { %2381 = vst [vmem:[#allocation10 + $0xd8] sm:$0xff] %v2347_v38 }
 0x2d4   :  { %v2349_v43 = vpop.f32.mrf.mxu3  ;;  %v2302_v27 = vpop.f32.mrf.mxu2 }
 0x2d5   :  { %v2350_v37 = vadd.f32 %v2349_v43, %v2301_v51  ;;  %v2303_v32 = vadd.f32 %v2302_v27, %v2254_v15 }
 0x2d7   :  { %2383 = vst [vmem:[#allocation10 + $0xe8] sm:$0xff] %v2350_v37 }
 0x2dc   :  { %v2351_v10 = vpop.f32.mrf.mxu3 }
 0x2dd   :  { %v2352_v4 = vadd.f32 %v2351_v10, %v2303_v32 }
 0x2df   :  { %2385 = vst [vmem:[#allocation10 + $0xf8] sm:$0xff] %v2352_v4 }
 0x2e0   :  { %2398 = dma.vmem_to_hbm [thread:$0]  %s2391_s15, 4096, %s2393_s18, [#allocation4], %s3394_s26, %s3394_s26, %s3395_s27  }
 0x2e1   :  { %3391 = dma.done.wait [#allocation4], 4096  }
 0x2e2   :  { %3392 = vsyncadd [#allocation4], 4294963200 }
 0x2e3   :  { %2403 = vsyncpa [#allocation3], 1 }
 0x2e4   :  { %2404 = vsyncpa [#allocation6], 1 }
 0x2e5   :  { %2405 = vsyncpa [#allocation9], 1 }
 0x2e6   :  { %2406 = vsyncpa [#allocation4], 1 }

</bundles_post_ra>
